<compile_context>
chip_gen: v5e
topology: v5e:2x2
jax: 0.10.0
libtpu: 0.0.40
codegen_flags: <defaults>
</compile_context>

<pallas_src>
import functools
import math

import jax
import jax.numpy as jnp
from jax.experimental import pallas as pl
from jax.experimental.pallas import tpu as pltpu


# ----------------------------------------------------------------------------
# Parameter packing: logical nested dict -> a handful of width-grouped slabs
# ----------------------------------------------------------------------------

def _logical_to_packed_entries(params, cfg):
    """Yield (key, 2-D array) pairs with all branch-parallel weights pre-packed."""
    H = cfg["hidden_size"]
    chans = cfg["num_channels"]
    entries = []
    add = lambda k, a: entries.append((k, a))

    for bname in ("regular", "residual"):
        bp = params[bname]
        cin = cfg["cnn_num_inputs"]
        for i, cout in enumerate(chans):
            lp = bp["tcn"][i]
            # fused taps: rows [0:cin] hit the causally-shifted (t-d) input,
            #             rows [cin:2cin] hit the current (t) input.
            add(f"{bname}/tcn{i}/w1", jnp.concatenate([lp["w1a"], lp["w1b"]], 0))
            add(f"{bname}/tcn{i}/b1", lp["b1"])
            add(f"{bname}/tcn{i}/w2", jnp.concatenate([lp["w2a"], lp["w2b"]], 0))
            add(f"{bname}/tcn{i}/b2", lp["b2"])
            if lp["wd"] is not None:
                add(f"{bname}/tcn{i}/wd", lp["wd"])
                add(f"{bname}/tcn{i}/bd", lp["bd"])
            cin = cout
        g = bp["grn"]
        add(f"{bname}/grn/was", jnp.concatenate([g["wa"], g["ws"]], 1))   # (C_last, 2H)
        add(f"{bname}/grn/wc", g["wc"])
        add(f"{bname}/grn/w1", g["w1"])
        add(f"{bname}/grn/w45", jnp.concatenate([g["w4"], g["w5"]], 1))   # (H, 2H)
        add(f"{bname}/grn/b2", g["b2"])
        add(f"{bname}/grn/b1", g["b1"])
        add(f"{bname}/grn/b45", jnp.concatenate([g["b4"], g["b5"]], 1))
        add(f"{bname}/grn/bs", g["bs"])
        add(f"{bname}/grn/gamma", g["gamma"])
        add(f"{bname}/grn/beta", g["beta"])
        a = bp["attn"]
        add(f"{bname}/attn/wq", jnp.concatenate([h["wq"] for h in a["heads"]], 1))
        add(f"{bname}/attn/bq", jnp.concatenate([h["bq"] for h in a["heads"]], 1))
        add(f"{bname}/attn/wkv", jnp.concatenate([h["wk"] for h in a["heads"]]
                                                 + [h["wv"] for h in a["heads"]], 1))
        add(f"{bname}/attn/bkv", jnp.concatenate([h["bk"] for h in a["heads"]]
                                                 + [h["bv"] for h in a["heads"]], 1))
        add(f"{bname}/attn/wo", jnp.concatenate([h["wo"] for h in a["heads"]], 0))
        add(f"{bname}/attn/bo", a["bo"])
        nout = bp["wl"].shape[-1]
        pad = max(8, nout) - nout   # lane-pad last layer so it joins the width-8 slabs
        wl, bl = bp["wl"], bp["bl"]
        if pad:
            wl = jnp.concatenate([wl, jnp.zeros((H, pad), jnp.float32)], 1)
            bl = jnp.concatenate([bl, jnp.zeros((1, pad), jnp.float32)], 1)
        add(f"{bname}/wl", wl)
        add(f"{bname}/bl", bl)

    add("ps_w", params["ps_w"])
    add("ps_b", params["ps_b"])
    # fc_cov_future weight gets a zero first row so it consumes future rows whose
    # column 0 is the slot later filled by the regular output (residual concat).
    add("fc_w", jnp.concatenate([jnp.zeros((1, H), jnp.float32), params["fc_w"]], 0))
    add("fc_b", params["fc_b"])
    return entries


def pack_params(params, cfg):
    """Group parameters by (weight/bias, lane width) into a few 2-D slabs.

    Returns (slabs {name: array}, index {key: (slab_name, row_off, n_rows)}).
    Weight row segments are padded to multiples of 8 so every in-kernel slice sits
    on a sublane-tile boundary (zero-copy view); offsets are static Python ints.
    """
    entries = _logical_to_packed_entries(params, cfg)
    groups, index = {}, {}
    for key, arr in entries:
        r, c = arr.shape
        name = ("b%d" if r == 1 else "w%d") % c
        lst = groups.setdefault(name, [])
        off = sum(rp for (_, _, rp) in lst)
        rp = r if r == 1 else (-(-r // 8)) * 8
        lst.append((key, arr, rp))
        index[key] = (name, off, r)
    slabs = {}
    for name, lst in groups.items():
        parts = []
        for _, arr, rp in lst:
            r, c = arr.shape
            if rp > r:
                arr = jnp.concatenate([arr, jnp.zeros((rp - r, c), arr.dtype)], 0)
            parts.append(arr)
        slabs[name] = jnp.concatenate(parts, 0)
    return slabs, index


# ----------------------------------------------------------------------------
# The single fused Pallas kernel (one grid step == one batch element)
# ----------------------------------------------------------------------------

def _tadnet_kernel(*refs, slab_names, index, H, nh, Q, chans, Cin):
    f32 = jnp.float32
    src_ref, tcf_ref, stat_ref = refs[:3]
    slab = dict(zip(slab_names, refs[3:3 + len(slab_names)]))
    out_ref = refs[3 + len(slab_names)]

    SL = src_ref.shape[0]
    TL = tcf_ref.shape[0]
    dh = H // nh

    def w(key):
        # Static, sublane-aligned view into the packed slab; loaded at use site so
        # Mosaic keeps weight live ranges short (no eager whole-tree load).
        name, off, rows = index[key]
        return slab[name][off:off + rows, :]

    def mm(x, ww):
        return jnp.dot(x, ww, preferred_element_type=f32)

    relu = lambda x: jnp.maximum(x, 0.0)

    def causal_shift(z, d):
        # z[t] <- z[t-d], zeros for t < d: XLU sublane roll + VPU mask, no MXU pass.
        rolled = pltpu.roll(z, shift=d, axis=0)
        row = jax.lax.broadcasted_iota(jnp.int32, z.shape, 0)
        return jnp.where(row < d, 0.0, rolled)

    def tcn(x, bname):
        h, cin = x, Cin
        for i, cout in enumerate(chans):
            d = 2 ** i
            pfx = f"{bname}/tcn{i}"

            def conv(z, wkey, bkey):
                # k=2 dilated causal conv as ONE matmul on lane-concatenated taps.
                zz = jnp.concatenate([causal_shift(z, d), z], axis=-1)
                return relu(mm(zz, w(wkey)) + w(bkey))

            h1 = conv(h, f"{pfx}/w1", f"{pfx}/b1")
            h2 = conv(h1, f"{pfx}/w2", f"{pfx}/b2")
            res = h if cin == cout else mm(h, w(f"{pfx}/wd")) + w(f"{pfx}/bd")
            h = relu(h2 + res)
            cin = cout
        return h

    def grn(a, ctx, bname):
        pfx = f"{bname}/grn"
        two = mm(a, w(f"{pfx}/was"))                                 # [eta2_a | skip]
        eta2 = two[:, :H] + mm(ctx, w(f"{pfx}/wc")) + w(f"{pfx}/b2")
        eta2 = jnp.where(eta2 > 0, eta2, jnp.exp(jnp.minimum(eta2, 0.0)) - 1.0)  # ELU
        eta1 = mm(eta2, w(f"{pfx}/w1")) + w(f"{pfx}/b1")
        gv = mm(eta1, w(f"{pfx}/w45")) + w(f"{pfx}/b45")             # [gate_pre | value]
        gate = 1.0 / (1.0 + jnp.exp(-gv[:, :H]))                     # exact sigmoid (parity)
        h = two[:, H:] + w(f"{pfx}/bs") + gate * gv[:, H:]
        mu = jnp.mean(h, axis=-1, keepdims=True)
        var = jnp.mean((h - mu) ** 2, axis=-1, keepdims=True)
        return (h - mu) * jax.lax.rsqrt(var + 1e-5) * w(f"{pfx}/gamma") + w(f"{pfx}/beta")

    def mha(x, q_start, bname):
        # query = x[q_start:], key/value = x; packed QKV and output projections.
        pfx = f"{bname}/attn"
        scale = 1.0 / math.sqrt(dh)
        q_all = mm(x[q_start:, :], w(f"{pfx}/wq")) + w(f"{pfx}/bq")   # (TL, nh*dh)
        kv = mm(x, w(f"{pfx}/wkv")) + w(f"{pfx}/bkv")                 # (L, 2*nh*dh)
        outs = []
        for hd in range(nh):
            q = q_all[:, hd * dh:(hd + 1) * dh]
            k = kv[:, hd * dh:(hd + 1) * dh]
            v = kv[:, (nh + hd) * dh:(nh + hd + 1) * dh]
            s = jax.lax.dot_general(q, k, (((1,), (1,)), ((), ())),
                                    preferred_element_type=f32) * scale
            s = s - jnp.max(s, axis=-1, keepdims=True)
            e = jnp.exp(s)
            p = e * pl.reciprocal(jnp.sum(e, axis=-1, keepdims=True), approx=True)
            outs.append(mm(p, v))                                     # (TL, dh)
        o = jnp.concatenate(outs, axis=-1)                            # (TL, nh*dh)
        return mm(o, w(f"{pfx}/wo")) + w(f"{pfx}/bo")

    src = src_ref[...]                  # (SL, Cin) history rows of this batch element
    tcf = tcf_ref[...]                  # (TL, Cin) col 0 = regular slot (zeros), cols 1: = cov
    stat = stat_ref[0]                  # (1, S)    static covariates

    # ---- shared encoders -----------------------------------------------------
    emb = relu(mm(stat, w("ps_w")) + w("ps_b"))                       # process_static
    ff = mm(tcf, w("fc_w")) + w("fc_b")                               # fc_cov_future

    # ---- regular block --------------------------------------------------------
    cnn = tcn(src, "regular")                                         # (SL, C_last)
    fp = grn(cnn, emb, "regular")                                     # (SL, H)
    ao = mha(jnp.concatenate([fp, ff], axis=0), SL, "regular")        # (TL, H)
    reg = (mm(ao, w("regular/wl")) + w("regular/bl"))[:, :1]          # (TL, 1)

    # ---- residual block: input = [source ; (regular | future time covariates)] -
    col = jax.lax.broadcasted_iota(jnp.int32, (TL, Cin), 1)
    res_in = jnp.concatenate([src, tcf + jnp.where(col == 0, reg, 0.0)], axis=0)
    cnn2 = tcn(res_in, "residual")                                    # (L2, C_last)
    fp2 = grn(cnn2, emb, "residual")                                  # (L2, H)
    ao2 = mha(fp2, SL, "residual")                                    # (TL, H)
    y = (mm(ao2, w("residual/wl")) + w("residual/bl"))[:, :Q]         # (TL, Q)

    # quantile sign shaping + regular/residual recomposition, all in-kernel
    qi = jax.lax.broadcasted_iota(jnp.int32, (TL, Q), 1)
    hq = Q // 2
    shaped = jnp.where(qi < hq, -jnp.abs(y), jnp.where(qi > hq, jnp.abs(y), y))
    out_ref[...] = (shaped + reg).astype(out_ref.dtype)


# ----------------------------------------------------------------------------
# Wrapper: layout-only input prep, one pallas_call for the whole forward
# ----------------------------------------------------------------------------

def tadnet_forward(params, source_data, time_cov_future, static_cov, cfg):
    assert cfg.get("fourier_P") is None  # TODO(synk): SeasonalBasis branch not implemented
    B, Cin, SL = source_data.shape
    _, ntc, TL = time_cov_future.shape
    assert Cin == ntc + 1, "residual concat requires cnn_num_inputs == 1 + num_time_cov"
    Q = cfg["quantiles_num"]

    # Layout-only preprocessing (cheap XLA transposes); future rows carry a zero
    # column 0 = the slot of the regular output inside the residual-block input.
    src_rows = jnp.transpose(source_data, (0, 2, 1)).reshape(B * SL, Cin)
    tcf_rows = jnp.transpose(time_cov_future, (0, 2, 1))
    tcf_cols = jnp.concatenate(
        [jnp.zeros((B, TL, 1), jnp.float32), tcf_rows], axis=-1).reshape(B * TL, Cin)
    stat3 = static_cov.reshape(B, 1, -1)

    slabs, index = pack_params(params, cfg)
    slab_names = tuple(sorted(slabs))
    slab_arrays = [slabs[n] for n in slab_names]

    kernel = functools.partial(
        _tadnet_kernel, slab_names=slab_names, index=index,
        H=cfg["hidden_size"], nh=cfg["num_heads"], Q=Q,
        chans=tuple(cfg["num_channels"]), Cin=Cin)

    batch_map = lambda b: (b, 0)
    in_specs = [
        pl.BlockSpec((SL, Cin), batch_map),                        # history rows of batch b
        pl.BlockSpec((TL, Cin), batch_map),                        # future-cov rows of batch b
        pl.BlockSpec((1, 1, static_cov.shape[-1]), lambda b: (b, 0, 0)),
    ] + [pl.BlockSpec(a.shape, lambda b: (0, 0)) for a in slab_arrays]   # slabs: fetched once

    out = pl.pallas_call(
        kernel,
        grid=(B,),
        in_specs=in_specs,
        out_specs=pl.BlockSpec((TL, Q), batch_map),
        out_shape=jax.ShapeDtypeStruct((B * TL, Q), jnp.float32),
        compiler_params=pltpu.CompilerParams(
            dimension_semantics=("parallel",)),                    # v7x: one batch per TensorCore
    )(src_rows, tcf_cols, stat3, *slab_arrays)

    # rows are (batch-major, time); final PyTorch layout is (batch, quantiles, target_len)
    return out.reshape(B, TL, Q).transpose(0, 2, 1)


# ----------------------------------------------------------------------------
# Deterministic parameter init (logical layout; packing happens in pack_params)
# ----------------------------------------------------------------------------

def make_params(key, cfg):
    keys = iter(jax.random.split(key, 512))
    w = lambda *s: 0.1 * jax.random.normal(next(keys), s, jnp.float32)
    z = lambda *s: jnp.zeros(s, jnp.float32)
    H = cfg["hidden_size"]
    nh = cfg["num_heads"]
    dh = H // nh
    C_last = cfg["num_channels"][-1]

    def tcn_params():
        levels, cin = [], cfg["cnn_num_inputs"]
        for cout in cfg["num_channels"]:
            levels.append(dict(
                w1a=w(cin, cout), w1b=w(cin, cout), b1=z(1, cout),      # taps t-d / t
                w2a=w(cout, cout), w2b=w(cout, cout), b2=z(1, cout),
                wd=w(cin, cout) if cin != cout else None,
                bd=z(1, cout) if cin != cout else None))
            cin = cout
        return levels

    def grn_params():
        return dict(wa=w(C_last, H), wc=w(H, H), b2=z(1, H),
                    w1=w(H, H), b1=z(1, H), w4=w(H, H), b4=z(1, H),
                    w5=w(H, H), b5=z(1, H), ws=w(C_last, H), bs=z(1, H),
                    gamma=jnp.ones((1, H), jnp.float32), beta=z(1, H))

    def attn_params():
        heads = [dict(wq=w(H, dh), wk=w(H, dh), wv=w(H, dh),
                      bq=z(1, dh), bk=z(1, dh), bv=z(1, dh),
                      wo=w(dh, H)) for _ in range(nh)]
        return dict(heads=heads, bo=z(1, H))

    def block_params(is_regular):
        nout = 1 if is_regular else cfg["quantiles_num"]
        return dict(tcn=tcn_params(), grn=grn_params(), attn=attn_params(),
                    wl=w(H, nout), bl=z(1, nout))

    return dict(regular=block_params(True),
                residual=block_params(False),
                ps_w=w(sum(cfg["static_cov_dim"]), H), ps_b=z(1, H),
                fc_w=w(cfg["num_time_cov"], H), fc_b=z(1, H))


# ----------------------------------------------------------------------------

if __name__ == "__main__":
    cfg = dict(cnn_num_inputs=4,           # must equal 1 + num_time_cov (residual concat)
               num_channels=[8, 8],
               dropout=0.1,                # identity at inference
               static_cov_dim=[5],
               hidden_size=16,
               num_time_cov=3,
               num_heads=2,
               source_len=16,
               target_len=8,
               quantiles_num=3,
               fourier_P=None)

    key = jax.random.PRNGKey(0)
    kx, kt, ks, kp = jax.random.split(key, 4)
    B = 2
    source_data = jax.random.normal(kx, (B, cfg["cnn_num_inputs"], cfg["source_len"]),
                                    jnp.float32)
    time_cov_future = jax.random.normal(kt, (B, cfg["num_time_cov"], cfg["target_len"]),
                                        jnp.float32)
    static_cov = jax.random.normal(ks, (B, sum(cfg["static_cov_dim"])), jnp.float32)

    params = make_params(kp, cfg)
    fwd = jax.jit(functools.partial(tadnet_forward, cfg=cfg))
    out = fwd(params, source_data, time_cov_future, static_cov)
    out = jax.block_until_ready(out)
    assert out.shape == (B, cfg["quantiles_num"], cfg["target_len"]), out.shape
    assert bool(jnp.all(jnp.isfinite(out)))
    print("KERNEL_OK")
</pallas_src>

<mosaic_0001>
module attributes {stable_mosaic.version = 11 : i64} {
  func.func @_tadnet_kernel(%arg0: i32, %arg1: memref<16x4xf32, #tpu.memory_space<vmem>>, %arg2: memref<8x4xf32, #tpu.memory_space<vmem>>, %arg3: memref<1x1x5xf32, #tpu.memory_space<vmem>>, %arg4: memref<16x16xf32, #tpu.memory_space<vmem>>, %arg5: memref<4x32xf32, #tpu.memory_space<vmem>>, %arg6: memref<12x8xf32, #tpu.memory_space<vmem>>, %arg7: memref<144x16xf32, #tpu.memory_space<vmem>>, %arg8: memref<80x32xf32, #tpu.memory_space<vmem>>, %arg9: memref<160x8xf32, #tpu.memory_space<vmem>>, %arg10: memref<8x3xf32, #tpu.memory_space<vmem>>) attributes {dimension_semantics = [#tpu.dimension_semantics<parallel>], iteration_bounds = array<i64: 2>, scalar_prefetch = 0 : i64, scratch_operands = 0 : i64, tpu.core_type = #tpu.core_type<tc>, window_params = [{transform_indices = @transform_0, window_bounds = array<i64: 16, 4>}, {transform_indices = @transform_1, window_bounds = array<i64: 8, 4>}, {transform_indices = @transform_2, window_bounds = array<i64: 1, 1, 5>}, {pipeline_mode = #tpu.pipeline_mode<synchronous>, transform_indices = @transform_3, window_bounds = array<i64: 16, 16>}, {pipeline_mode = #tpu.pipeline_mode<synchronous>, transform_indices = @transform_4, window_bounds = array<i64: 4, 32>}, {pipeline_mode = #tpu.pipeline_mode<synchronous>, transform_indices = @transform_5, window_bounds = array<i64: 12, 8>}, {pipeline_mode = #tpu.pipeline_mode<synchronous>, transform_indices = @transform_6, window_bounds = array<i64: 144, 16>}, {pipeline_mode = #tpu.pipeline_mode<synchronous>, transform_indices = @transform_7, window_bounds = array<i64: 80, 32>}, {pipeline_mode = #tpu.pipeline_mode<synchronous>, transform_indices = @transform_8, window_bounds = array<i64: 160, 8>}, {transform_indices = @transform_9, window_bounds = array<i64: 8, 3>}]} {
    %c0 = arith.constant 0 : index
    %c0_0 = arith.constant 0 : index
    %0 = vector.load %arg1[%c0, %c0_0] : memref<16x4xf32, #tpu.memory_space<vmem>>, vector<16x4xf32>
    %c0_1 = arith.constant 0 : index
    %c0_2 = arith.constant 0 : index
    %1 = vector.load %arg2[%c0_1, %c0_2] : memref<8x4xf32, #tpu.memory_space<vmem>>, vector<8x4xf32>
    %c0_3 = arith.constant 0 : index
    %c0_4 = arith.constant 0 : index
    %c0_5 = arith.constant 0 : index
    %2 = vector.load %arg3[%c0_3, %c0_4, %c0_5] : memref<1x1x5xf32, #tpu.memory_space<vmem>>, vector<1x1x5xf32>
    %3 = vector.shape_cast %2 : vector<1x1x5xf32> to vector<1x5xf32>
    %c128 = arith.constant 128 : index
    %c0_6 = arith.constant 0 : index
    %4 = vector.load %arg7[%c128, %c0_6] : memref<144x16xf32, #tpu.memory_space<vmem>>, vector<5x16xf32>
    %cst = arith.constant dense<0.000000e+00> : vector<1x16xf32>
    %5 = tpu.matmul %3, %4, %cst {dimension_numbers = #tpu.dot_dimension_numbers<[1], [0], [0], [1], [0, 0, 1, 1], [], []>} : vector<1x5xf32>, vector<5x16xf32>, vector<1x16xf32> -> vector<1x16xf32>
    %c14 = arith.constant 14 : index
    %c0_7 = arith.constant 0 : index
    %6 = vector.load %arg4[%c14, %c0_7] : memref<16x16xf32, #tpu.memory_space<vmem>>, vector<1x16xf32>
    %7 = arith.addf %5, %6 : vector<1x16xf32>
    %cst_8 = arith.constant 0.000000e+00 : f32
    %8 = vector.broadcast %cst_8 : f32 to vector<1x16xf32>
    %9 = arith.maximumf %7, %8 : vector<1x16xf32>
    %c136 = arith.constant 136 : index
    %c0_9 = arith.constant 0 : index
    %10 = vector.load %arg7[%c136, %c0_9] : memref<144x16xf32, #tpu.memory_space<vmem>>, vector<4x16xf32>
    %cst_10 = arith.constant dense<0.000000e+00> : vector<8x16xf32>
    %11 = tpu.matmul %1, %10, %cst_10 {dimension_numbers = #tpu.dot_dimension_numbers<[1], [0], [0], [1], [0, 0, 1, 1], [], []>} : vector<8x4xf32>, vector<4x16xf32>, vector<8x16xf32> -> vector<8x16xf32>
    %c15 = arith.constant 15 : index
    %c0_11 = arith.constant 0 : index
    %12 = vector.load %arg4[%c15, %c0_11] : memref<16x16xf32, #tpu.memory_space<vmem>>, vector<1x16xf32>
    %13 = vector.broadcast %12 : vector<1x16xf32> to vector<8x16xf32>
    %14 = arith.addf %11, %13 : vector<8x16xf32>
    %c1_i32 = arith.constant 1 : i32
    %15 = tpu.dynamic_rotate %0 by %c1_i32 dim 0 : vector<16x4xf32>, i32 -> vector<16x4xf32>
    %16 = tpu.iota {dimensions = array<i32: 0>} : vector<16x4xi32>
    %c1_i32_12 = arith.constant 1 : i32
    %17 = vector.broadcast %c1_i32_12 : i32 to vector<16x4xi32>
    %18 = arith.cmpi slt, %16, %17 : vector<16x4xi32>
    %cst_13 = arith.constant 0.000000e+00 : f32
    %19 = vector.broadcast %cst_13 : f32 to vector<16x4xf32>
    %20 = arith.select %18, %19, %15 : vector<16x4xi1>, vector<16x4xf32>
    %21 = tpu.concatenate %20, %0 in 1 : vector<16x4xf32>, vector<16x4xf32> -> vector<16x8xf32>
    %c0_14 = arith.constant 0 : index
    %c0_15 = arith.constant 0 : index
    %22 = vector.load %arg9[%c0_14, %c0_15] : memref<160x8xf32, #tpu.memory_space<vmem>>, vector<8x8xf32>
    %cst_16 = arith.constant dense<0.000000e+00> : vector<16x8xf32>
    %23 = tpu.matmul %21, %22, %cst_16 {dimension_numbers = #tpu.dot_dimension_numbers<[1], [0], [0], [1], [0, 0, 1, 1], [], []>} : vector<16x8xf32>, vector<8x8xf32>, vector<16x8xf32> -> vector<16x8xf32>
    %c0_17 = arith.constant 0 : index
    %c0_18 = arith.constant 0 : index
    %24 = vector.load %arg6[%c0_17, %c0_18] : memref<12x8xf32, #tpu.memory_space<vmem>>, vector<1x8xf32>
    %25 = vector.broadcast %24 : vector<1x8xf32> to vector<16x8xf32>
    %26 = arith.addf %23, %25 : vector<16x8xf32>
    %cst_19 = arith.constant 0.000000e+00 : f32
    %27 = vector.broadcast %cst_19 : f32 to vector<16x8xf32>
    %28 = arith.maximumf %26, %27 : vector<16x8xf32>
    %c1_i32_20 = arith.constant 1 : i32
    %29 = tpu.dynamic_rotate %28 by %c1_i32_20 dim 0 : vector<16x8xf32>, i32 -> vector<16x8xf32>
    %30 = tpu.iota {dimensions = array<i32: 0>} : vector<16x8xi32>
    %c1_i32_21 = arith.constant 1 : i32
    %31 = vector.broadcast %c1_i32_21 : i32 to vector<16x8xi32>
    %32 = arith.cmpi slt, %30, %31 : vector<16x8xi32>
    %cst_22 = arith.constant 0.000000e+00 : f32
    %33 = vector.broadcast %cst_22 : f32 to vector<16x8xf32>
    %34 = arith.select %32, %33, %29 : vector<16x8xi1>, vector<16x8xf32>
    %35 = tpu.concatenate %34, %28 in 1 : vector<16x8xf32>, vector<16x8xf32> -> vector<16x16xf32>
    %c8 = arith.constant 8 : index
    %c0_23 = arith.constant 0 : index
    %36 = vector.load %arg9[%c8, %c0_23] : memref<160x8xf32, #tpu.memory_space<vmem>>, vector<16x8xf32>
    %cst_24 = arith.constant dense<0.000000e+00> : vector<16x8xf32>
    %37 = tpu.matmul %35, %36, %cst_24 {dimension_numbers = #tpu.dot_dimension_numbers<[1], [0], [0], [1], [0, 0, 1, 1], [], []>} : vector<16x16xf32>, vector<16x8xf32>, vector<16x8xf32> -> vector<16x8xf32>
    %c1 = arith.constant 1 : index
    %c0_25 = arith.constant 0 : index
    %38 = vector.load %arg6[%c1, %c0_25] : memref<12x8xf32, #tpu.memory_space<vmem>>, vector<1x8xf32>
    %39 = vector.broadcast %38 : vector<1x8xf32> to vector<16x8xf32>
    %40 = arith.addf %37, %39 : vector<16x8xf32>
    %cst_26 = arith.constant 0.000000e+00 : f32
    %41 = vector.broadcast %cst_26 : f32 to vector<16x8xf32>
    %42 = arith.maximumf %40, %41 : vector<16x8xf32>
    %c24 = arith.constant 24 : index
    %c0_27 = arith.constant 0 : index
    %43 = vector.load %arg9[%c24, %c0_27] : memref<160x8xf32, #tpu.memory_space<vmem>>, vector<4x8xf32>
    %cst_28 = arith.constant dense<0.000000e+00> : vector<16x8xf32>
    %44 = tpu.matmul %0, %43, %cst_28 {dimension_numbers = #tpu.dot_dimension_numbers<[1], [0], [0], [1], [0, 0, 1, 1], [], []>} : vector<16x4xf32>, vector<4x8xf32>, vector<16x8xf32> -> vector<16x8xf32>
    %c2 = arith.constant 2 : index
    %c0_29 = arith.constant 0 : index
    %45 = vector.load %arg6[%c2, %c0_29] : memref<12x8xf32, #tpu.memory_space<vmem>>, vector<1x8xf32>
    %46 = vector.broadcast %45 : vector<1x8xf32> to vector<16x8xf32>
    %47 = arith.addf %44, %46 : vector<16x8xf32>
    %48 = arith.addf %42, %47 : vector<16x8xf32>
    %cst_30 = arith.constant 0.000000e+00 : f32
    %49 = vector.broadcast %cst_30 : f32 to vector<16x8xf32>
    %50 = arith.maximumf %48, %49 : vector<16x8xf32>
    %c2_i32 = arith.constant 2 : i32
    %51 = tpu.dynamic_rotate %50 by %c2_i32 dim 0 : vector<16x8xf32>, i32 -> vector<16x8xf32>
    %52 = tpu.iota {dimensions = array<i32: 0>} : vector<16x8xi32>
    %c2_i32_31 = arith.constant 2 : i32
    %53 = vector.broadcast %c2_i32_31 : i32 to vector<16x8xi32>
    %54 = arith.cmpi slt, %52, %53 : vector<16x8xi32>
    %cst_32 = arith.constant 0.000000e+00 : f32
    %55 = vector.broadcast %cst_32 : f32 to vector<16x8xf32>
    %56 = arith.select %54, %55, %51 : vector<16x8xi1>, vector<16x8xf32>
    %57 = tpu.concatenate %56, %50 in 1 : vector<16x8xf32>, vector<16x8xf32> -> vector<16x16xf32>
    %c32 = arith.constant 32 : index
    %c0_33 = arith.constant 0 : index
    %58 = vector.load %arg9[%c32, %c0_33] : memref<160x8xf32, #tpu.memory_space<vmem>>, vector<16x8xf32>
    %cst_34 = arith.constant dense<0.000000e+00> : vector<16x8xf32>
    %59 = tpu.matmul %57, %58, %cst_34 {dimension_numbers = #tpu.dot_dimension_numbers<[1], [0], [0], [1], [0, 0, 1, 1], [], []>} : vector<16x16xf32>, vector<16x8xf32>, vector<16x8xf32> -> vector<16x8xf32>
    %c3 = arith.constant 3 : index
    %c0_35 = arith.constant 0 : index
    %60 = vector.load %arg6[%c3, %c0_35] : memref<12x8xf32, #tpu.memory_space<vmem>>, vector<1x8xf32>
    %61 = vector.broadcast %60 : vector<1x8xf32> to vector<16x8xf32>
    %62 = arith.addf %59, %61 : vector<16x8xf32>
    %cst_36 = arith.constant 0.000000e+00 : f32
    %63 = vector.broadcast %cst_36 : f32 to vector<16x8xf32>
    %64 = arith.maximumf %62, %63 : vector<16x8xf32>
    %c2_i32_37 = arith.constant 2 : i32
    %65 = tpu.dynamic_rotate %64 by %c2_i32_37 dim 0 : vector<16x8xf32>, i32 -> vector<16x8xf32>
    %66 = tpu.iota {dimensions = array<i32: 0>} : vector<16x8xi32>
    %c2_i32_38 = arith.constant 2 : i32
    %67 = vector.broadcast %c2_i32_38 : i32 to vector<16x8xi32>
    %68 = arith.cmpi slt, %66, %67 : vector<16x8xi32>
    %cst_39 = arith.constant 0.000000e+00 : f32
    %69 = vector.broadcast %cst_39 : f32 to vector<16x8xf32>
    %70 = arith.select %68, %69, %65 : vector<16x8xi1>, vector<16x8xf32>
    %71 = tpu.concatenate %70, %64 in 1 : vector<16x8xf32>, vector<16x8xf32> -> vector<16x16xf32>
    %c48 = arith.constant 48 : index
    %c0_40 = arith.constant 0 : index
    %72 = vector.load %arg9[%c48, %c0_40] : memref<160x8xf32, #tpu.memory_space<vmem>>, vector<16x8xf32>
    %cst_41 = arith.constant dense<0.000000e+00> : vector<16x8xf32>
    %73 = tpu.matmul %71, %72, %cst_41 {dimension_numbers = #tpu.dot_dimension_numbers<[1], [0], [0], [1], [0, 0, 1, 1], [], []>} : vector<16x16xf32>, vector<16x8xf32>, vector<16x8xf32> -> vector<16x8xf32>
    %c4 = arith.constant 4 : index
    %c0_42 = arith.constant 0 : index
    %74 = vector.load %arg6[%c4, %c0_42] : memref<12x8xf32, #tpu.memory_space<vmem>>, vector<1x8xf32>
    %75 = vector.broadcast %74 : vector<1x8xf32> to vector<16x8xf32>
    %76 = arith.addf %73, %75 : vector<16x8xf32>
    %cst_43 = arith.constant 0.000000e+00 : f32
    %77 = vector.broadcast %cst_43 : f32 to vector<16x8xf32>
    %78 = arith.maximumf %76, %77 : vector<16x8xf32>
    %79 = arith.addf %78, %50 : vector<16x8xf32>
    %cst_44 = arith.constant 0.000000e+00 : f32
    %80 = vector.broadcast %cst_44 : f32 to vector<16x8xf32>
    %81 = arith.maximumf %79, %80 : vector<16x8xf32>
    %c0_45 = arith.constant 0 : index
    %c0_46 = arith.constant 0 : index
    %82 = vector.load %arg8[%c0_45, %c0_46] : memref<80x32xf32, #tpu.memory_space<vmem>>, vector<8x32xf32>
    %cst_47 = arith.constant dense<0.000000e+00> : vector<16x32xf32>
    %83 = tpu.matmul %81, %82, %cst_47 {dimension_numbers = #tpu.dot_dimension_numbers<[1], [0], [0], [1], [0, 0, 1, 1], [], []>} : vector<16x8xf32>, vector<8x32xf32>, vector<16x32xf32> -> vector<16x32xf32>
    %84 = vector.extract_strided_slice %83 {offsets = [0, 0], sizes = [16, 16], strides = [1, 1]} : vector<16x32xf32> to vector<16x16xf32>
    %c0_48 = arith.constant 0 : index
    %c0_49 = arith.constant 0 : index
    %85 = vector.load %arg7[%c0_48, %c0_49] : memref<144x16xf32, #tpu.memory_space<vmem>>, vector<16x16xf32>
    %cst_50 = arith.constant dense<0.000000e+00> : vector<1x16xf32>
    %86 = tpu.matmul %9, %85, %cst_50 {dimension_numbers = #tpu.dot_dimension_numbers<[1], [0], [0], [1], [0, 0, 1, 1], [], []>} : vector<1x16xf32>, vector<16x16xf32>, vector<1x16xf32> -> vector<1x16xf32>
    %87 = vector.broadcast %86 : vector<1x16xf32> to vector<16x16xf32>
    %88 = arith.addf %84, %87 : vector<16x16xf32>
    %c0_51 = arith.constant 0 : index
    %c0_52 = arith.constant 0 : index
    %89 = vector.load %arg4[%c0_51, %c0_52] : memref<16x16xf32, #tpu.memory_space<vmem>>, vector<1x16xf32>
    %90 = vector.broadcast %89 : vector<1x16xf32> to vector<16x16xf32>
    %91 = arith.addf %88, %90 : vector<16x16xf32>
    %cst_53 = arith.constant 0.000000e+00 : f32
    %92 = vector.broadcast %cst_53 : f32 to vector<16x16xf32>
    %93 = arith.cmpf ogt, %91, %92 : vector<16x16xf32>
    %cst_54 = arith.constant 0.000000e+00 : f32
    %94 = vector.broadcast %cst_54 : f32 to vector<16x16xf32>
    %95 = arith.minimumf %91, %94 : vector<16x16xf32>
    %96 = math.exp %95 : vector<16x16xf32>
    %cst_55 = arith.constant 1.000000e+00 : f32
    %97 = vector.broadcast %cst_55 : f32 to vector<16x16xf32>
    %98 = arith.subf %96, %97 : vector<16x16xf32>
    %99 = arith.select %93, %91, %98 : vector<16x16xi1>, vector<16x16xf32>
    %c16 = arith.constant 16 : index
    %c0_56 = arith.constant 0 : index
    %100 = vector.load %arg7[%c16, %c0_56] : memref<144x16xf32, #tpu.memory_space<vmem>>, vector<16x16xf32>
    %cst_57 = arith.constant dense<0.000000e+00> : vector<16x16xf32>
    %101 = tpu.matmul %99, %100, %cst_57 {dimension_numbers = #tpu.dot_dimension_numbers<[1], [0], [0], [1], [0, 0, 1, 1], [], []>} : vector<16x16xf32>, vector<16x16xf32>, vector<16x16xf32> -> vector<16x16xf32>
    %c1_58 = arith.constant 1 : index
    %c0_59 = arith.constant 0 : index
    %102 = vector.load %arg4[%c1_58, %c0_59] : memref<16x16xf32, #tpu.memory_space<vmem>>, vector<1x16xf32>
    %103 = vector.broadcast %102 : vector<1x16xf32> to vector<16x16xf32>
    %104 = arith.addf %101, %103 : vector<16x16xf32>
    %c8_60 = arith.constant 8 : index
    %c0_61 = arith.constant 0 : index
    %105 = vector.load %arg8[%c8_60, %c0_61] : memref<80x32xf32, #tpu.memory_space<vmem>>, vector<16x32xf32>
    %cst_62 = arith.constant dense<0.000000e+00> : vector<16x32xf32>
    %106 = tpu.matmul %104, %105, %cst_62 {dimension_numbers = #tpu.dot_dimension_numbers<[1], [0], [0], [1], [0, 0, 1, 1], [], []>} : vector<16x16xf32>, vector<16x32xf32>, vector<16x32xf32> -> vector<16x32xf32>
    %c0_63 = arith.constant 0 : index
    %c0_64 = arith.constant 0 : index
    %107 = vector.load %arg5[%c0_63, %c0_64] : memref<4x32xf32, #tpu.memory_space<vmem>>, vector<1x32xf32>
    %108 = vector.broadcast %107 : vector<1x32xf32> to vector<16x32xf32>
    %109 = arith.addf %106, %108 : vector<16x32xf32>
    %110 = vector.extract_strided_slice %109 {offsets = [0, 0], sizes = [16, 16], strides = [1, 1]} : vector<16x32xf32> to vector<16x16xf32>
    %cst_65 = arith.constant 0.000000e+00 : f32
    %111 = vector.broadcast %cst_65 : f32 to vector<16x16xf32>
    %112 = arith.subf %111, %110 : vector<16x16xf32>
    %113 = math.exp %112 : vector<16x16xf32>
    %cst_66 = arith.constant 1.000000e+00 : f32
    %114 = vector.broadcast %cst_66 : f32 to vector<16x16xf32>
    %115 = arith.addf %114, %113 : vector<16x16xf32>
    %cst_67 = arith.constant 1.000000e+00 : f32
    %116 = vector.broadcast %cst_67 : f32 to vector<16x16xf32>
    %117 = arith.divf %116, %115 : vector<16x16xf32>
    %118 = vector.extract_strided_slice %83 {offsets = [0, 16], sizes = [16, 16], strides = [1, 1]} : vector<16x32xf32> to vector<16x16xf32>
    %c2_68 = arith.constant 2 : index
    %c0_69 = arith.constant 0 : index
    %119 = vector.load %arg4[%c2_68, %c0_69] : memref<16x16xf32, #tpu.memory_space<vmem>>, vector<1x16xf32>
    %120 = vector.broadcast %119 : vector<1x16xf32> to vector<16x16xf32>
    %121 = arith.addf %118, %120 : vector<16x16xf32>
    %122 = vector.extract_strided_slice %109 {offsets = [0, 16], sizes = [16, 16], strides = [1, 1]} : vector<16x32xf32> to vector<16x16xf32>
    %123 = arith.mulf %117, %122 : vector<16x16xf32>
    %124 = arith.addf %121, %123 : vector<16x16xf32>
    %cst_70 = arith.constant dense<0.000000e+00> : vector<16xf32>
    %125 = vector.multi_reduction <add>, %124, %cst_70 [1] : vector<16x16xf32> to vector<16xf32>
    %126 = vector.shape_cast %125 : vector<16xf32> to vector<16x1xf32>
    %cst_71 = arith.constant 1.600000e+01 : f32
    %127 = vector.broadcast %cst_71 : f32 to vector<16x1xf32>
    %128 = arith.divf %126, %127 : vector<16x1xf32>
    %129 = vector.broadcast %128 : vector<16x1xf32> to vector<16x16xf32>
    %130 = arith.subf %124, %129 : vector<16x16xf32>
    %131 = arith.mulf %130, %130 : vector<16x16xf32>
    %cst_72 = arith.constant dense<0.000000e+00> : vector<16xf32>
    %132 = vector.multi_reduction <add>, %131, %cst_72 [1] : vector<16x16xf32> to vector<16xf32>
    %133 = vector.shape_cast %132 : vector<16xf32> to vector<16x1xf32>
    %cst_73 = arith.constant 1.600000e+01 : f32
    %134 = vector.broadcast %cst_73 : f32 to vector<16x1xf32>
    %135 = arith.divf %133, %134 : vector<16x1xf32>
    %136 = vector.broadcast %128 : vector<16x1xf32> to vector<16x16xf32>
    %137 = arith.subf %124, %136 : vector<16x16xf32>
    %cst_74 = arith.constant 9.99999974E-6 : f32
    %138 = vector.broadcast %cst_74 : f32 to vector<16x1xf32>
    %139 = arith.addf %135, %138 : vector<16x1xf32>
    %140 = math.rsqrt %139 : vector<16x1xf32>
    %141 = vector.broadcast %140 : vector<16x1xf32> to vector<16x16xf32>
    %142 = arith.mulf %137, %141 : vector<16x16xf32>
    %c3_75 = arith.constant 3 : index
    %c0_76 = arith.constant 0 : index
    %143 = vector.load %arg4[%c3_75, %c0_76] : memref<16x16xf32, #tpu.memory_space<vmem>>, vector<1x16xf32>
    %144 = vector.broadcast %143 : vector<1x16xf32> to vector<16x16xf32>
    %145 = arith.mulf %142, %144 : vector<16x16xf32>
    %c4_77 = arith.constant 4 : index
    %c0_78 = arith.constant 0 : index
    %146 = vector.load %arg4[%c4_77, %c0_78] : memref<16x16xf32, #tpu.memory_space<vmem>>, vector<1x16xf32>
    %147 = vector.broadcast %146 : vector<1x16xf32> to vector<16x16xf32>
    %148 = arith.addf %145, %147 : vector<16x16xf32>
    %149 = tpu.concatenate %148, %14 in 0 : vector<16x16xf32>, vector<8x16xf32> -> vector<24x16xf32>
    %150 = vector.extract_strided_slice %149 {offsets = [16, 0], sizes = [8, 16], strides = [1, 1]} : vector<24x16xf32> to vector<8x16xf32>
    %c32_79 = arith.constant 32 : index
    %c0_80 = arith.constant 0 : index
    %151 = vector.load %arg7[%c32_79, %c0_80] : memref<144x16xf32, #tpu.memory_space<vmem>>, vector<16x16xf32>
    %cst_81 = arith.constant dense<0.000000e+00> : vector<8x16xf32>
    %152 = tpu.matmul %150, %151, %cst_81 {dimension_numbers = #tpu.dot_dimension_numbers<[1], [0], [0], [1], [0, 0, 1, 1], [], []>} : vector<8x16xf32>, vector<16x16xf32>, vector<8x16xf32> -> vector<8x16xf32>
    %c5 = arith.constant 5 : index
    %c0_82 = arith.constant 0 : index
    %153 = vector.load %arg4[%c5, %c0_82] : memref<16x16xf32, #tpu.memory_space<vmem>>, vector<1x16xf32>
    %154 = vector.broadcast %153 : vector<1x16xf32> to vector<8x16xf32>
    %155 = arith.addf %152, %154 : vector<8x16xf32>
    %c24_83 = arith.constant 24 : index
    %c0_84 = arith.constant 0 : index
    %156 = vector.load %arg8[%c24_83, %c0_84] : memref<80x32xf32, #tpu.memory_space<vmem>>, vector<16x32xf32>
    %cst_85 = arith.constant dense<0.000000e+00> : vector<24x32xf32>
    %157 = tpu.matmul %149, %156, %cst_85 {dimension_numbers = #tpu.dot_dimension_numbers<[1], [0], [0], [1], [0, 0, 1, 1], [], []>} : vector<24x16xf32>, vector<16x32xf32>, vector<24x32xf32> -> vector<24x32xf32>
    %c1_86 = arith.constant 1 : index
    %c0_87 = arith.constant 0 : index
    %158 = vector.load %arg5[%c1_86, %c0_87] : memref<4x32xf32, #tpu.memory_space<vmem>>, vector<1x32xf32>
    %159 = vector.broadcast %158 : vector<1x32xf32> to vector<24x32xf32>
    %160 = arith.addf %157, %159 : vector<24x32xf32>
    %161 = vector.extract_strided_slice %155 {offsets = [0, 0], sizes = [8, 8], strides = [1, 1]} : vector<8x16xf32> to vector<8x8xf32>
    %162 = vector.extract_strided_slice %160 {offsets = [0, 0], sizes = [24, 8], strides = [1, 1]} : vector<24x32xf32> to vector<24x8xf32>
    %163 = vector.extract_strided_slice %160 {offsets = [0, 16], sizes = [24, 8], strides = [1, 1]} : vector<24x32xf32> to vector<24x8xf32>
    %cst_88 = arith.constant dense<0.000000e+00> : vector<8x24xf32>
    %164 = tpu.matmul %161, %162, %cst_88 {dimension_numbers = #tpu.dot_dimension_numbers<[1], [1], [0], [0], [0, 0, 1, 0], [], []>} : vector<8x8xf32>, vector<24x8xf32>, vector<8x24xf32> -> vector<8x24xf32>
    %cst_89 = arith.constant 0.353553385 : f32
    %165 = vector.broadcast %cst_89 : f32 to vector<8x24xf32>
    %166 = arith.mulf %164, %165 : vector<8x24xf32>
    %cst_90 = arith.constant dense<0xFF800000> : vector<8xf32>
    %167 = vector.multi_reduction <maximumf>, %166, %cst_90 [1] : vector<8x24xf32> to vector<8xf32>
    %168 = vector.shape_cast %167 : vector<8xf32> to vector<8x1xf32>
    %169 = vector.broadcast %168 : vector<8x1xf32> to vector<8x24xf32>
    %170 = arith.subf %166, %169 : vector<8x24xf32>
    %171 = math.exp %170 : vector<8x24xf32>
    %cst_91 = arith.constant dense<0.000000e+00> : vector<8xf32>
    %172 = vector.multi_reduction <add>, %171, %cst_91 [1] : vector<8x24xf32> to vector<8xf32>
    %173 = vector.shape_cast %172 : vector<8xf32> to vector<8x1xf32>
    %174 = tpu.reciprocal %173 {approx = true} : vector<8x1xf32> -> vector<8x1xf32>
    %175 = vector.broadcast %174 : vector<8x1xf32> to vector<8x24xf32>
    %176 = arith.mulf %171, %175 : vector<8x24xf32>
    %cst_92 = arith.constant dense<0.000000e+00> : vector<8x8xf32>
    %177 = tpu.matmul %176, %163, %cst_92 {dimension_numbers = #tpu.dot_dimension_numbers<[1], [0], [0], [1], [0, 0, 1, 1], [], []>} : vector<8x24xf32>, vector<24x8xf32>, vector<8x8xf32> -> vector<8x8xf32>
    %178 = vector.extract_strided_slice %155 {offsets = [0, 8], sizes = [8, 8], strides = [1, 1]} : vector<8x16xf32> to vector<8x8xf32>
    %179 = vector.extract_strided_slice %160 {offsets = [0, 8], sizes = [24, 8], strides = [1, 1]} : vector<24x32xf32> to vector<24x8xf32>
    %180 = vector.extract_strided_slice %160 {offsets = [0, 24], sizes = [24, 8], strides = [1, 1]} : vector<24x32xf32> to vector<24x8xf32>
    %cst_93 = arith.constant dense<0.000000e+00> : vector<8x24xf32>
    %181 = tpu.matmul %178, %179, %cst_93 {dimension_numbers = #tpu.dot_dimension_numbers<[1], [1], [0], [0], [0, 0, 1, 0], [], []>} : vector<8x8xf32>, vector<24x8xf32>, vector<8x24xf32> -> vector<8x24xf32>
    %cst_94 = arith.constant 0.353553385 : f32
    %182 = vector.broadcast %cst_94 : f32 to vector<8x24xf32>
    %183 = arith.mulf %181, %182 : vector<8x24xf32>
    %cst_95 = arith.constant dense<0xFF800000> : vector<8xf32>
    %184 = vector.multi_reduction <maximumf>, %183, %cst_95 [1] : vector<8x24xf32> to vector<8xf32>
    %185 = vector.shape_cast %184 : vector<8xf32> to vector<8x1xf32>
    %186 = vector.broadcast %185 : vector<8x1xf32> to vector<8x24xf32>
    %187 = arith.subf %183, %186 : vector<8x24xf32>
    %188 = math.exp %187 : vector<8x24xf32>
    %cst_96 = arith.constant dense<0.000000e+00> : vector<8xf32>
    %189 = vector.multi_reduction <add>, %188, %cst_96 [1] : vector<8x24xf32> to vector<8xf32>
    %190 = vector.shape_cast %189 : vector<8xf32> to vector<8x1xf32>
    %191 = tpu.reciprocal %190 {approx = true} : vector<8x1xf32> -> vector<8x1xf32>
    %192 = vector.broadcast %191 : vector<8x1xf32> to vector<8x24xf32>
    %193 = arith.mulf %188, %192 : vector<8x24xf32>
    %cst_97 = arith.constant dense<0.000000e+00> : vector<8x8xf32>
    %194 = tpu.matmul %193, %180, %cst_97 {dimension_numbers = #tpu.dot_dimension_numbers<[1], [0], [0], [1], [0, 0, 1, 1], [], []>} : vector<8x24xf32>, vector<24x8xf32>, vector<8x8xf32> -> vector<8x8xf32>
    %195 = tpu.concatenate %177, %194 in 1 : vector<8x8xf32>, vector<8x8xf32> -> vector<8x16xf32>
    %c48_98 = arith.constant 48 : index
    %c0_99 = arith.constant 0 : index
    %196 = vector.load %arg7[%c48_98, %c0_99] : memref<144x16xf32, #tpu.memory_space<vmem>>, vector<16x16xf32>
    %cst_100 = arith.constant dense<0.000000e+00> : vector<8x16xf32>
    %197 = tpu.matmul %195, %196, %cst_100 {dimension_numbers = #tpu.dot_dimension_numbers<[1], [0], [0], [1], [0, 0, 1, 1], [], []>} : vector<8x16xf32>, vector<16x16xf32>, vector<8x16xf32> -> vector<8x16xf32>
    %c6 = arith.constant 6 : index
    %c0_101 = arith.constant 0 : index
    %198 = vector.load %arg4[%c6, %c0_101] : memref<16x16xf32, #tpu.memory_space<vmem>>, vector<1x16xf32>
    %199 = vector.broadcast %198 : vector<1x16xf32> to vector<8x16xf32>
    %200 = arith.addf %197, %199 : vector<8x16xf32>
    %c64 = arith.constant 64 : index
    %c0_102 = arith.constant 0 : index
    %201 = vector.load %arg9[%c64, %c0_102] : memref<160x8xf32, #tpu.memory_space<vmem>>, vector<16x8xf32>
    %cst_103 = arith.constant dense<0.000000e+00> : vector<8x8xf32>
    %202 = tpu.matmul %200, %201, %cst_103 {dimension_numbers = #tpu.dot_dimension_numbers<[1], [0], [0], [1], [0, 0, 1, 1], [], []>} : vector<8x16xf32>, vector<16x8xf32>, vector<8x8xf32> -> vector<8x8xf32>
    %c5_104 = arith.constant 5 : index
    %c0_105 = arith.constant 0 : index
    %203 = vector.load %arg6[%c5_104, %c0_105] : memref<12x8xf32, #tpu.memory_space<vmem>>, vector<1x8xf32>
    %204 = vector.broadcast %203 : vector<1x8xf32> to vector<8x8xf32>
    %205 = arith.addf %202, %204 : vector<8x8xf32>
    %206 = vector.extract_strided_slice %205 {offsets = [0, 0], sizes = [8, 1], strides = [1, 1]} : vector<8x8xf32> to vector<8x1xf32>
    %207 = tpu.iota {dimensions = array<i32: 1>} : vector<8x4xi32>
    %c0_i32 = arith.constant 0 : i32
    %208 = vector.broadcast %c0_i32 : i32 to vector<8x4xi32>
    %209 = arith.cmpi eq, %207, %208 : vector<8x4xi32>
    %cst_106 = arith.constant 0.000000e+00 : f32
    %210 = vector.shape_cast %206 : vector<8x1xf32> to vector<8x1xf32>
    %211 = vector.broadcast %210 : vector<8x1xf32> to vector<8x4xf32>
    %212 = vector.broadcast %cst_106 : f32 to vector<8x4xf32>
    %213 = arith.select %209, %211, %212 : vector<8x4xi1>, vector<8x4xf32>
    %214 = arith.addf %1, %213 : vector<8x4xf32>
    %215 = tpu.concatenate %0, %214 in 0 : vector<16x4xf32>, vector<8x4xf32> -> vector<24x4xf32>
    %c1_i32_107 = arith.constant 1 : i32
    %216 = tpu.dynamic_rotate %215 by %c1_i32_107 dim 0 : vector<24x4xf32>, i32 -> vector<24x4xf32>
    %217 = tpu.iota {dimensions = array<i32: 0>} : vector<24x4xi32>
    %c1_i32_108 = arith.constant 1 : i32
    %218 = vector.broadcast %c1_i32_108 : i32 to vector<24x4xi32>
    %219 = arith.cmpi slt, %217, %218 : vector<24x4xi32>
    %cst_109 = arith.constant 0.000000e+00 : f32
    %220 = vector.broadcast %cst_109 : f32 to vector<24x4xf32>
    %221 = arith.select %219, %220, %216 : vector<24x4xi1>, vector<24x4xf32>
    %222 = tpu.concatenate %221, %215 in 1 : vector<24x4xf32>, vector<24x4xf32> -> vector<24x8xf32>
    %c80 = arith.constant 80 : index
    %c0_110 = arith.constant 0 : index
    %223 = vector.load %arg9[%c80, %c0_110] : memref<160x8xf32, #tpu.memory_space<vmem>>, vector<8x8xf32>
    %cst_111 = arith.constant dense<0.000000e+00> : vector<24x8xf32>
    %224 = tpu.matmul %222, %223, %cst_111 {dimension_numbers = #tpu.dot_dimension_numbers<[1], [0], [0], [1], [0, 0, 1, 1], [], []>} : vector<24x8xf32>, vector<8x8xf32>, vector<24x8xf32> -> vector<24x8xf32>
    %c6_112 = arith.constant 6 : index
    %c0_113 = arith.constant 0 : index
    %225 = vector.load %arg6[%c6_112, %c0_113] : memref<12x8xf32, #tpu.memory_space<vmem>>, vector<1x8xf32>
    %226 = vector.broadcast %225 : vector<1x8xf32> to vector<24x8xf32>
    %227 = arith.addf %224, %226 : vector<24x8xf32>
    %cst_114 = arith.constant 0.000000e+00 : f32
    %228 = vector.broadcast %cst_114 : f32 to vector<24x8xf32>
    %229 = arith.maximumf %227, %228 : vector<24x8xf32>
    %c1_i32_115 = arith.constant 1 : i32
    %230 = tpu.dynamic_rotate %229 by %c1_i32_115 dim 0 : vector<24x8xf32>, i32 -> vector<24x8xf32>
    %231 = tpu.iota {dimensions = array<i32: 0>} : vector<24x8xi32>
    %c1_i32_116 = arith.constant 1 : i32
    %232 = vector.broadcast %c1_i32_116 : i32 to vector<24x8xi32>
    %233 = arith.cmpi slt, %231, %232 : vector<24x8xi32>
    %cst_117 = arith.constant 0.000000e+00 : f32
    %234 = vector.broadcast %cst_117 : f32 to vector<24x8xf32>
    %235 = arith.select %233, %234, %230 : vector<24x8xi1>, vector<24x8xf32>
    %236 = tpu.concatenate %235, %229 in 1 : vector<24x8xf32>, vector<24x8xf32> -> vector<24x16xf32>
    %c88 = arith.constant 88 : index
    %c0_118 = arith.constant 0 : index
    %237 = vector.load %arg9[%c88, %c0_118] : memref<160x8xf32, #tpu.memory_space<vmem>>, vector<16x8xf32>
    %cst_119 = arith.constant dense<0.000000e+00> : vector<24x8xf32>
    %238 = tpu.matmul %236, %237, %cst_119 {dimension_numbers = #tpu.dot_dimension_numbers<[1], [0], [0], [1], [0, 0, 1, 1], [], []>} : vector<24x16xf32>, vector<16x8xf32>, vector<24x8xf32> -> vector<24x8xf32>
    %c7 = arith.constant 7 : index
    %c0_120 = arith.constant 0 : index
    %239 = vector.load %arg6[%c7, %c0_120] : memref<12x8xf32, #tpu.memory_space<vmem>>, vector<1x8xf32>
    %240 = vector.broadcast %239 : vector<1x8xf32> to vector<24x8xf32>
    %241 = arith.addf %238, %240 : vector<24x8xf32>
    %cst_121 = arith.constant 0.000000e+00 : f32
    %242 = vector.broadcast %cst_121 : f32 to vector<24x8xf32>
    %243 = arith.maximumf %241, %242 : vector<24x8xf32>
    %c104 = arith.constant 104 : index
    %c0_122 = arith.constant 0 : index
    %244 = vector.load %arg9[%c104, %c0_122] : memref<160x8xf32, #tpu.memory_space<vmem>>, vector<4x8xf32>
    %cst_123 = arith.constant dense<0.000000e+00> : vector<24x8xf32>
    %245 = tpu.matmul %215, %244, %cst_123 {dimension_numbers = #tpu.dot_dimension_numbers<[1], [0], [0], [1], [0, 0, 1, 1], [], []>} : vector<24x4xf32>, vector<4x8xf32>, vector<24x8xf32> -> vector<24x8xf32>
    %c8_124 = arith.constant 8 : index
    %c0_125 = arith.constant 0 : index
    %246 = vector.load %arg6[%c8_124, %c0_125] : memref<12x8xf32, #tpu.memory_space<vmem>>, vector<1x8xf32>
    %247 = vector.broadcast %246 : vector<1x8xf32> to vector<24x8xf32>
    %248 = arith.addf %245, %247 : vector<24x8xf32>
    %249 = arith.addf %243, %248 : vector<24x8xf32>
    %cst_126 = arith.constant 0.000000e+00 : f32
    %250 = vector.broadcast %cst_126 : f32 to vector<24x8xf32>
    %251 = arith.maximumf %249, %250 : vector<24x8xf32>
    %c2_i32_127 = arith.constant 2 : i32
    %252 = tpu.dynamic_rotate %251 by %c2_i32_127 dim 0 : vector<24x8xf32>, i32 -> vector<24x8xf32>
    %253 = tpu.iota {dimensions = array<i32: 0>} : vector<24x8xi32>
    %c2_i32_128 = arith.constant 2 : i32
    %254 = vector.broadcast %c2_i32_128 : i32 to vector<24x8xi32>
    %255 = arith.cmpi slt, %253, %254 : vector<24x8xi32>
    %cst_129 = arith.constant 0.000000e+00 : f32
    %256 = vector.broadcast %cst_129 : f32 to vector<24x8xf32>
    %257 = arith.select %255, %256, %252 : vector<24x8xi1>, vector<24x8xf32>
    %258 = tpu.concatenate %257, %251 in 1 : vector<24x8xf32>, vector<24x8xf32> -> vector<24x16xf32>
    %c112 = arith.constant 112 : index
    %c0_130 = arith.constant 0 : index
    %259 = vector.load %arg9[%c112, %c0_130] : memref<160x8xf32, #tpu.memory_space<vmem>>, vector<16x8xf32>
    %cst_131 = arith.constant dense<0.000000e+00> : vector<24x8xf32>
    %260 = tpu.matmul %258, %259, %cst_131 {dimension_numbers = #tpu.dot_dimension_numbers<[1], [0], [0], [1], [0, 0, 1, 1], [], []>} : vector<24x16xf32>, vector<16x8xf32>, vector<24x8xf32> -> vector<24x8xf32>
    %c9 = arith.constant 9 : index
    %c0_132 = arith.constant 0 : index
    %261 = vector.load %arg6[%c9, %c0_132] : memref<12x8xf32, #tpu.memory_space<vmem>>, vector<1x8xf32>
    %262 = vector.broadcast %261 : vector<1x8xf32> to vector<24x8xf32>
    %263 = arith.addf %260, %262 : vector<24x8xf32>
    %cst_133 = arith.constant 0.000000e+00 : f32
    %264 = vector.broadcast %cst_133 : f32 to vector<24x8xf32>
    %265 = arith.maximumf %263, %264 : vector<24x8xf32>
    %c2_i32_134 = arith.constant 2 : i32
    %266 = tpu.dynamic_rotate %265 by %c2_i32_134 dim 0 : vector<24x8xf32>, i32 -> vector<24x8xf32>
    %267 = tpu.iota {dimensions = array<i32: 0>} : vector<24x8xi32>
    %c2_i32_135 = arith.constant 2 : i32
    %268 = vector.broadcast %c2_i32_135 : i32 to vector<24x8xi32>
    %269 = arith.cmpi slt, %267, %268 : vector<24x8xi32>
    %cst_136 = arith.constant 0.000000e+00 : f32
    %270 = vector.broadcast %cst_136 : f32 to vector<24x8xf32>
    %271 = arith.select %269, %270, %266 : vector<24x8xi1>, vector<24x8xf32>
    %272 = tpu.concatenate %271, %265 in 1 : vector<24x8xf32>, vector<24x8xf32> -> vector<24x16xf32>
    %c128_137 = arith.constant 128 : index
    %c0_138 = arith.constant 0 : index
    %273 = vector.load %arg9[%c128_137, %c0_138] : memref<160x8xf32, #tpu.memory_space<vmem>>, vector<16x8xf32>
    %cst_139 = arith.constant dense<0.000000e+00> : vector<24x8xf32>
    %274 = tpu.matmul %272, %273, %cst_139 {dimension_numbers = #tpu.dot_dimension_numbers<[1], [0], [0], [1], [0, 0, 1, 1], [], []>} : vector<24x16xf32>, vector<16x8xf32>, vector<24x8xf32> -> vector<24x8xf32>
    %c10 = arith.constant 10 : index
    %c0_140 = arith.constant 0 : index
    %275 = vector.load %arg6[%c10, %c0_140] : memref<12x8xf32, #tpu.memory_space<vmem>>, vector<1x8xf32>
    %276 = vector.broadcast %275 : vector<1x8xf32> to vector<24x8xf32>
    %277 = arith.addf %274, %276 : vector<24x8xf32>
    %cst_141 = arith.constant 0.000000e+00 : f32
    %278 = vector.broadcast %cst_141 : f32 to vector<24x8xf32>
    %279 = arith.maximumf %277, %278 : vector<24x8xf32>
    %280 = arith.addf %279, %251 : vector<24x8xf32>
    %cst_142 = arith.constant 0.000000e+00 : f32
    %281 = vector.broadcast %cst_142 : f32 to vector<24x8xf32>
    %282 = arith.maximumf %280, %281 : vector<24x8xf32>
    %c40 = arith.constant 40 : index
    %c0_143 = arith.constant 0 : index
    %283 = vector.load %arg8[%c40, %c0_143] : memref<80x32xf32, #tpu.memory_space<vmem>>, vector<8x32xf32>
    %cst_144 = arith.constant dense<0.000000e+00> : vector<24x32xf32>
    %284 = tpu.matmul %282, %283, %cst_144 {dimension_numbers = #tpu.dot_dimension_numbers<[1], [0], [0], [1], [0, 0, 1, 1], [], []>} : vector<24x8xf32>, vector<8x32xf32>, vector<24x32xf32> -> vector<24x32xf32>
    %285 = vector.extract_strided_slice %284 {offsets = [0, 0], sizes = [24, 16], strides = [1, 1]} : vector<24x32xf32> to vector<24x16xf32>
    %c64_145 = arith.constant 64 : index
    %c0_146 = arith.constant 0 : index
    %286 = vector.load %arg7[%c64_145, %c0_146] : memref<144x16xf32, #tpu.memory_space<vmem>>, vector<16x16xf32>
    %cst_147 = arith.constant dense<0.000000e+00> : vector<1x16xf32>
    %287 = tpu.matmul %9, %286, %cst_147 {dimension_numbers = #tpu.dot_dimension_numbers<[1], [0], [0], [1], [0, 0, 1, 1], [], []>} : vector<1x16xf32>, vector<16x16xf32>, vector<1x16xf32> -> vector<1x16xf32>
    %288 = vector.broadcast %287 : vector<1x16xf32> to vector<24x16xf32>
    %289 = arith.addf %285, %288 : vector<24x16xf32>
    %c7_148 = arith.constant 7 : index
    %c0_149 = arith.constant 0 : index
    %290 = vector.load %arg4[%c7_148, %c0_149] : memref<16x16xf32, #tpu.memory_space<vmem>>, vector<1x16xf32>
    %291 = vector.broadcast %290 : vector<1x16xf32> to vector<24x16xf32>
    %292 = arith.addf %289, %291 : vector<24x16xf32>
    %cst_150 = arith.constant 0.000000e+00 : f32
    %293 = vector.broadcast %cst_150 : f32 to vector<24x16xf32>
    %294 = arith.cmpf ogt, %292, %293 : vector<24x16xf32>
    %cst_151 = arith.constant 0.000000e+00 : f32
    %295 = vector.broadcast %cst_151 : f32 to vector<24x16xf32>
    %296 = arith.minimumf %292, %295 : vector<24x16xf32>
    %297 = math.exp %296 : vector<24x16xf32>
    %cst_152 = arith.constant 1.000000e+00 : f32
    %298 = vector.broadcast %cst_152 : f32 to vector<24x16xf32>
    %299 = arith.subf %297, %298 : vector<24x16xf32>
    %300 = arith.select %294, %292, %299 : vector<24x16xi1>, vector<24x16xf32>
    %c80_153 = arith.constant 80 : index
    %c0_154 = arith.constant 0 : index
    %301 = vector.load %arg7[%c80_153, %c0_154] : memref<144x16xf32, #tpu.memory_space<vmem>>, vector<16x16xf32>
    %cst_155 = arith.constant dense<0.000000e+00> : vector<24x16xf32>
    %302 = tpu.matmul %300, %301, %cst_155 {dimension_numbers = #tpu.dot_dimension_numbers<[1], [0], [0], [1], [0, 0, 1, 1], [], []>} : vector<24x16xf32>, vector<16x16xf32>, vector<24x16xf32> -> vector<24x16xf32>
    %c8_156 = arith.constant 8 : index
    %c0_157 = arith.constant 0 : index
    %303 = vector.load %arg4[%c8_156, %c0_157] : memref<16x16xf32, #tpu.memory_space<vmem>>, vector<1x16xf32>
    %304 = vector.broadcast %303 : vector<1x16xf32> to vector<24x16xf32>
    %305 = arith.addf %302, %304 : vector<24x16xf32>
    %c48_158 = arith.constant 48 : index
    %c0_159 = arith.constant 0 : index
    %306 = vector.load %arg8[%c48_158, %c0_159] : memref<80x32xf32, #tpu.memory_space<vmem>>, vector<16x32xf32>
    %cst_160 = arith.constant dense<0.000000e+00> : vector<24x32xf32>
    %307 = tpu.matmul %305, %306, %cst_160 {dimension_numbers = #tpu.dot_dimension_numbers<[1], [0], [0], [1], [0, 0, 1, 1], [], []>} : vector<24x16xf32>, vector<16x32xf32>, vector<24x32xf32> -> vector<24x32xf32>
    %c2_161 = arith.constant 2 : index
    %c0_162 = arith.constant 0 : index
    %308 = vector.load %arg5[%c2_161, %c0_162] : memref<4x32xf32, #tpu.memory_space<vmem>>, vector<1x32xf32>
    %309 = vector.broadcast %308 : vector<1x32xf32> to vector<24x32xf32>
    %310 = arith.addf %307, %309 : vector<24x32xf32>
    %311 = vector.extract_strided_slice %310 {offsets = [0, 0], sizes = [24, 16], strides = [1, 1]} : vector<24x32xf32> to vector<24x16xf32>
    %cst_163 = arith.constant 0.000000e+00 : f32
    %312 = vector.broadcast %cst_163 : f32 to vector<24x16xf32>
    %313 = arith.subf %312, %311 : vector<24x16xf32>
    %314 = math.exp %313 : vector<24x16xf32>
    %cst_164 = arith.constant 1.000000e+00 : f32
    %315 = vector.broadcast %cst_164 : f32 to vector<24x16xf32>
    %316 = arith.addf %315, %314 : vector<24x16xf32>
    %cst_165 = arith.constant 1.000000e+00 : f32
    %317 = vector.broadcast %cst_165 : f32 to vector<24x16xf32>
    %318 = arith.divf %317, %316 : vector<24x16xf32>
    %319 = vector.extract_strided_slice %284 {offsets = [0, 16], sizes = [24, 16], strides = [1, 1]} : vector<24x32xf32> to vector<24x16xf32>
    %c9_166 = arith.constant 9 : index
    %c0_167 = arith.constant 0 : index
    %320 = vector.load %arg4[%c9_166, %c0_167] : memref<16x16xf32, #tpu.memory_space<vmem>>, vector<1x16xf32>
    %321 = vector.broadcast %320 : vector<1x16xf32> to vector<24x16xf32>
    %322 = arith.addf %319, %321 : vector<24x16xf32>
    %323 = vector.extract_strided_slice %310 {offsets = [0, 16], sizes = [24, 16], strides = [1, 1]} : vector<24x32xf32> to vector<24x16xf32>
    %324 = arith.mulf %318, %323 : vector<24x16xf32>
    %325 = arith.addf %322, %324 : vector<24x16xf32>
    %cst_168 = arith.constant dense<0.000000e+00> : vector<24xf32>
    %326 = vector.multi_reduction <add>, %325, %cst_168 [1] : vector<24x16xf32> to vector<24xf32>
    %327 = vector.shape_cast %326 : vector<24xf32> to vector<24x1xf32>
    %cst_169 = arith.constant 1.600000e+01 : f32
    %328 = vector.broadcast %cst_169 : f32 to vector<24x1xf32>
    %329 = arith.divf %327, %328 : vector<24x1xf32>
    %330 = vector.broadcast %329 : vector<24x1xf32> to vector<24x16xf32>
    %331 = arith.subf %325, %330 : vector<24x16xf32>
    %332 = arith.mulf %331, %331 : vector<24x16xf32>
    %cst_170 = arith.constant dense<0.000000e+00> : vector<24xf32>
    %333 = vector.multi_reduction <add>, %332, %cst_170 [1] : vector<24x16xf32> to vector<24xf32>
    %334 = vector.shape_cast %333 : vector<24xf32> to vector<24x1xf32>
    %cst_171 = arith.constant 1.600000e+01 : f32
    %335 = vector.broadcast %cst_171 : f32 to vector<24x1xf32>
    %336 = arith.divf %334, %335 : vector<24x1xf32>
    %337 = vector.broadcast %329 : vector<24x1xf32> to vector<24x16xf32>
    %338 = arith.subf %325, %337 : vector<24x16xf32>
    %cst_172 = arith.constant 9.99999974E-6 : f32
    %339 = vector.broadcast %cst_172 : f32 to vector<24x1xf32>
    %340 = arith.addf %336, %339 : vector<24x1xf32>
    %341 = math.rsqrt %340 : vector<24x1xf32>
    %342 = vector.broadcast %341 : vector<24x1xf32> to vector<24x16xf32>
    %343 = arith.mulf %338, %342 : vector<24x16xf32>
    %c10_173 = arith.constant 10 : index
    %c0_174 = arith.constant 0 : index
    %344 = vector.load %arg4[%c10_173, %c0_174] : memref<16x16xf32, #tpu.memory_space<vmem>>, vector<1x16xf32>
    %345 = vector.broadcast %344 : vector<1x16xf32> to vector<24x16xf32>
    %346 = arith.mulf %343, %345 : vector<24x16xf32>
    %c11 = arith.constant 11 : index
    %c0_175 = arith.constant 0 : index
    %347 = vector.load %arg4[%c11, %c0_175] : memref<16x16xf32, #tpu.memory_space<vmem>>, vector<1x16xf32>
    %348 = vector.broadcast %347 : vector<1x16xf32> to vector<24x16xf32>
    %349 = arith.addf %346, %348 : vector<24x16xf32>
    %350 = vector.extract_strided_slice %349 {offsets = [16, 0], sizes = [8, 16], strides = [1, 1]} : vector<24x16xf32> to vector<8x16xf32>
    %c96 = arith.constant 96 : index
    %c0_176 = arith.constant 0 : index
    %351 = vector.load %arg7[%c96, %c0_176] : memref<144x16xf32, #tpu.memory_space<vmem>>, vector<16x16xf32>
    %cst_177 = arith.constant dense<0.000000e+00> : vector<8x16xf32>
    %352 = tpu.matmul %350, %351, %cst_177 {dimension_numbers = #tpu.dot_dimension_numbers<[1], [0], [0], [1], [0, 0, 1, 1], [], []>} : vector<8x16xf32>, vector<16x16xf32>, vector<8x16xf32> -> vector<8x16xf32>
    %c12 = arith.constant 12 : index
    %c0_178 = arith.constant 0 : index
    %353 = vector.load %arg4[%c12, %c0_178] : memref<16x16xf32, #tpu.memory_space<vmem>>, vector<1x16xf32>
    %354 = vector.broadcast %353 : vector<1x16xf32> to vector<8x16xf32>
    %355 = arith.addf %352, %354 : vector<8x16xf32>
    %c64_179 = arith.constant 64 : index
    %c0_180 = arith.constant 0 : index
    %356 = vector.load %arg8[%c64_179, %c0_180] : memref<80x32xf32, #tpu.memory_space<vmem>>, vector<16x32xf32>
    %cst_181 = arith.constant dense<0.000000e+00> : vector<24x32xf32>
    %357 = tpu.matmul %349, %356, %cst_181 {dimension_numbers = #tpu.dot_dimension_numbers<[1], [0], [0], [1], [0, 0, 1, 1], [], []>} : vector<24x16xf32>, vector<16x32xf32>, vector<24x32xf32> -> vector<24x32xf32>
    %c3_182 = arith.constant 3 : index
    %c0_183 = arith.constant 0 : index
    %358 = vector.load %arg5[%c3_182, %c0_183] : memref<4x32xf32, #tpu.memory_space<vmem>>, vector<1x32xf32>
    %359 = vector.broadcast %358 : vector<1x32xf32> to vector<24x32xf32>
    %360 = arith.addf %357, %359 : vector<24x32xf32>
    %361 = vector.extract_strided_slice %355 {offsets = [0, 0], sizes = [8, 8], strides = [1, 1]} : vector<8x16xf32> to vector<8x8xf32>
    %362 = vector.extract_strided_slice %360 {offsets = [0, 0], sizes = [24, 8], strides = [1, 1]} : vector<24x32xf32> to vector<24x8xf32>
    %363 = vector.extract_strided_slice %360 {offsets = [0, 16], sizes = [24, 8], strides = [1, 1]} : vector<24x32xf32> to vector<24x8xf32>
    %cst_184 = arith.constant dense<0.000000e+00> : vector<8x24xf32>
    %364 = tpu.matmul %361, %362, %cst_184 {dimension_numbers = #tpu.dot_dimension_numbers<[1], [1], [0], [0], [0, 0, 1, 0], [], []>} : vector<8x8xf32>, vector<24x8xf32>, vector<8x24xf32> -> vector<8x24xf32>
    %cst_185 = arith.constant 0.353553385 : f32
    %365 = vector.broadcast %cst_185 : f32 to vector<8x24xf32>
    %366 = arith.mulf %364, %365 : vector<8x24xf32>
    %cst_186 = arith.constant dense<0xFF800000> : vector<8xf32>
    %367 = vector.multi_reduction <maximumf>, %366, %cst_186 [1] : vector<8x24xf32> to vector<8xf32>
    %368 = vector.shape_cast %367 : vector<8xf32> to vector<8x1xf32>
    %369 = vector.broadcast %368 : vector<8x1xf32> to vector<8x24xf32>
    %370 = arith.subf %366, %369 : vector<8x24xf32>
    %371 = math.exp %370 : vector<8x24xf32>
    %cst_187 = arith.constant dense<0.000000e+00> : vector<8xf32>
    %372 = vector.multi_reduction <add>, %371, %cst_187 [1] : vector<8x24xf32> to vector<8xf32>
    %373 = vector.shape_cast %372 : vector<8xf32> to vector<8x1xf32>
    %374 = tpu.reciprocal %373 {approx = true} : vector<8x1xf32> -> vector<8x1xf32>
    %375 = vector.broadcast %374 : vector<8x1xf32> to vector<8x24xf32>
    %376 = arith.mulf %371, %375 : vector<8x24xf32>
    %cst_188 = arith.constant dense<0.000000e+00> : vector<8x8xf32>
    %377 = tpu.matmul %376, %363, %cst_188 {dimension_numbers = #tpu.dot_dimension_numbers<[1], [0], [0], [1], [0, 0, 1, 1], [], []>} : vector<8x24xf32>, vector<24x8xf32>, vector<8x8xf32> -> vector<8x8xf32>
    %378 = vector.extract_strided_slice %355 {offsets = [0, 8], sizes = [8, 8], strides = [1, 1]} : vector<8x16xf32> to vector<8x8xf32>
    %379 = vector.extract_strided_slice %360 {offsets = [0, 8], sizes = [24, 8], strides = [1, 1]} : vector<24x32xf32> to vector<24x8xf32>
    %380 = vector.extract_strided_slice %360 {offsets = [0, 24], sizes = [24, 8], strides = [1, 1]} : vector<24x32xf32> to vector<24x8xf32>
    %cst_189 = arith.constant dense<0.000000e+00> : vector<8x24xf32>
    %381 = tpu.matmul %378, %379, %cst_189 {dimension_numbers = #tpu.dot_dimension_numbers<[1], [1], [0], [0], [0, 0, 1, 0], [], []>} : vector<8x8xf32>, vector<24x8xf32>, vector<8x24xf32> -> vector<8x24xf32>
    %cst_190 = arith.constant 0.353553385 : f32
    %382 = vector.broadcast %cst_190 : f32 to vector<8x24xf32>
    %383 = arith.mulf %381, %382 : vector<8x24xf32>
    %cst_191 = arith.constant dense<0xFF800000> : vector<8xf32>
    %384 = vector.multi_reduction <maximumf>, %383, %cst_191 [1] : vector<8x24xf32> to vector<8xf32>
    %385 = vector.shape_cast %384 : vector<8xf32> to vector<8x1xf32>
    %386 = vector.broadcast %385 : vector<8x1xf32> to vector<8x24xf32>
    %387 = arith.subf %383, %386 : vector<8x24xf32>
    %388 = math.exp %387 : vector<8x24xf32>
    %cst_192 = arith.constant dense<0.000000e+00> : vector<8xf32>
    %389 = vector.multi_reduction <add>, %388, %cst_192 [1] : vector<8x24xf32> to vector<8xf32>
    %390 = vector.shape_cast %389 : vector<8xf32> to vector<8x1xf32>
    %391 = tpu.reciprocal %390 {approx = true} : vector<8x1xf32> -> vector<8x1xf32>
    %392 = vector.broadcast %391 : vector<8x1xf32> to vector<8x24xf32>
    %393 = arith.mulf %388, %392 : vector<8x24xf32>
    %cst_193 = arith.constant dense<0.000000e+00> : vector<8x8xf32>
    %394 = tpu.matmul %393, %380, %cst_193 {dimension_numbers = #tpu.dot_dimension_numbers<[1], [0], [0], [1], [0, 0, 1, 1], [], []>} : vector<8x24xf32>, vector<24x8xf32>, vector<8x8xf32> -> vector<8x8xf32>
    %395 = tpu.concatenate %377, %394 in 1 : vector<8x8xf32>, vector<8x8xf32> -> vector<8x16xf32>
    %c112_194 = arith.constant 112 : index
    %c0_195 = arith.constant 0 : index
    %396 = vector.load %arg7[%c112_194, %c0_195] : memref<144x16xf32, #tpu.memory_space<vmem>>, vector<16x16xf32>
    %cst_196 = arith.constant dense<0.000000e+00> : vector<8x16xf32>
    %397 = tpu.matmul %395, %396, %cst_196 {dimension_numbers = #tpu.dot_dimension_numbers<[1], [0], [0], [1], [0, 0, 1, 1], [], []>} : vector<8x16xf32>, vector<16x16xf32>, vector<8x16xf32> -> vector<8x16xf32>
    %c13 = arith.constant 13 : index
    %c0_197 = arith.constant 0 : index
    %398 = vector.load %arg4[%c13, %c0_197] : memref<16x16xf32, #tpu.memory_space<vmem>>, vector<1x16xf32>
    %399 = vector.broadcast %398 : vector<1x16xf32> to vector<8x16xf32>
    %400 = arith.addf %397, %399 : vector<8x16xf32>
    %c144 = arith.constant 144 : index
    %c0_198 = arith.constant 0 : index
    %401 = vector.load %arg9[%c144, %c0_198] : memref<160x8xf32, #tpu.memory_space<vmem>>, vector<16x8xf32>
    %cst_199 = arith.constant dense<0.000000e+00> : vector<8x8xf32>
    %402 = tpu.matmul %400, %401, %cst_199 {dimension_numbers = #tpu.dot_dimension_numbers<[1], [0], [0], [1], [0, 0, 1, 1], [], []>} : vector<8x16xf32>, vector<16x8xf32>, vector<8x8xf32> -> vector<8x8xf32>
    %c11_200 = arith.constant 11 : index
    %c0_201 = arith.constant 0 : index
    %403 = vector.load %arg6[%c11_200, %c0_201] : memref<12x8xf32, #tpu.memory_space<vmem>>, vector<1x8xf32>
    %404 = vector.broadcast %403 : vector<1x8xf32> to vector<8x8xf32>
    %405 = arith.addf %402, %404 : vector<8x8xf32>
    %406 = vector.extract_strided_slice %405 {offsets = [0, 0], sizes = [8, 3], strides = [1, 1]} : vector<8x8xf32> to vector<8x3xf32>
    %407 = tpu.iota {dimensions = array<i32: 1>} : vector<8x3xi32>
    %c1_i32_202 = arith.constant 1 : i32
    %408 = vector.broadcast %c1_i32_202 : i32 to vector<8x3xi32>
    %409 = arith.cmpi slt, %407, %408 : vector<8x3xi32>
    %410 = math.absf %406 : vector<8x3xf32>
    %cst_203 = arith.constant 0.000000e+00 : f32
    %411 = vector.broadcast %cst_203 : f32 to vector<8x3xf32>
    %412 = arith.subf %411, %410 : vector<8x3xf32>
    %c1_i32_204 = arith.constant 1 : i32
    %413 = vector.broadcast %c1_i32_204 : i32 to vector<8x3xi32>
    %414 = arith.cmpi sgt, %407, %413 : vector<8x3xi32>
    %415 = math.absf %406 : vector<8x3xf32>
    %416 = arith.select %414, %415, %406 : vector<8x3xi1>, vector<8x3xf32>
    %417 = arith.select %409, %412, %416 : vector<8x3xi1>, vector<8x3xf32>
    %418 = vector.broadcast %206 : vector<8x1xf32> to vector<8x3xf32>
    %419 = arith.addf %417, %418 : vector<8x3xf32>
    %c0_205 = arith.constant 0 : index
    %c0_206 = arith.constant 0 : index
    %420 = vector.load %arg10[%c0_205, %c0_206] : memref<8x3xf32, #tpu.memory_space<vmem>>, vector<8x3xf32>
    tpu.vector_store %arg10[%c0_205, %c0_206], %419 {strides = array<i32>} : memref<8x3xf32, #tpu.memory_space<vmem>>, vector<8x3xf32>,
    return
  }
  func.func @transform_0(%arg0: i32) -> (i32, i32) {
    %c0_i32 = arith.constant 0 : i32
    %c0_i32_0 = arith.constant 0 : i32
    return %arg0, %c0_i32 : i32, i32
  }
  func.func @transform_1(%arg0: i32) -> (i32, i32) {
    %c0_i32 = arith.constant 0 : i32
    %c0_i32_0 = arith.constant 0 : i32
    return %arg0, %c0_i32 : i32, i32
  }
  func.func @transform_2(%arg0: i32) -> (i32, i32, i32) {
    %c0_i32 = arith.constant 0 : i32
    %c0_i32_0 = arith.constant 0 : i32
    %c0_i32_1 = arith.constant 0 : i32
    return %arg0, %c0_i32, %c0_i32_0 : i32, i32, i32
  }
  func.func @transform_3(%arg0: i32) -> (i32, i32) {
    %c0_i32 = arith.constant 0 : i32
    %c0_i32_0 = arith.constant 0 : i32
    %c0_i32_1 = arith.constant 0 : i32
    return %c0_i32, %c0_i32_0 : i32, i32
  }
  func.func @transform_4(%arg0: i32) -> (i32, i32) {
    %c0_i32 = arith.constant 0 : i32
    %c0_i32_0 = arith.constant 0 : i32
    %c0_i32_1 = arith.constant 0 : i32
    return %c0_i32, %c0_i32_0 : i32, i32
  }
  func.func @transform_5(%arg0: i32) -> (i32, i32) {
    %c0_i32 = arith.constant 0 : i32
    %c0_i32_0 = arith.constant 0 : i32
    %c0_i32_1 = arith.constant 0 : i32
    return %c0_i32, %c0_i32_0 : i32, i32
  }
  func.func @transform_6(%arg0: i32) -> (i32, i32) {
    %c0_i32 = arith.constant 0 : i32
    %c0_i32_0 = arith.constant 0 : i32
    %c0_i32_1 = arith.constant 0 : i32
    return %c0_i32, %c0_i32_0 : i32, i32
  }
  func.func @transform_7(%arg0: i32) -> (i32, i32) {
    %c0_i32 = arith.constant 0 : i32
    %c0_i32_0 = arith.constant 0 : i32
    %c0_i32_1 = arith.constant 0 : i32
    return %c0_i32, %c0_i32_0 : i32, i32
  }
  func.func @transform_8(%arg0: i32) -> (i32, i32) {
    %c0_i32 = arith.constant 0 : i32
    %c0_i32_0 = arith.constant 0 : i32
    %c0_i32_1 = arith.constant 0 : i32
    return %c0_i32, %c0_i32_0 : i32, i32
  }
  func.func @transform_9(%arg0: i32) -> (i32, i32) {
    %c0_i32 = arith.constant 0 : i32
    %c0_i32_0 = arith.constant 0 : i32
    return %arg0, %c0_i32 : i32, i32
  }
}

</mosaic_0001>

<bundles_post_ra>
// kernel: tadnet_forward.1
= control target key start
LH: loop header
LB: loop body
LE: loop exit
PB: predicated region body
PF: predicated region fallthrough
CT: control target
= control target key end

     0   :  { %s2588_s30 = smov 0   ;;  %s3215_s0 = inlined_call_operand.vmem [shape: f32[32,4], index: 0, kind: input, shape index: {}]   ;;  %s3216_s1 = inlined_call_operand.vmem [shape: f32[16,4], index: 1, kind: input, shape index: {}]   ;;  %s3217_s2 = inlined_call_operand.vmem [shape: f32[2,1,5], index: 2, kind: input, shape index: {}]   ;;  %s3218_s3 = inlined_call_operand.vmem [shape: f32[16,16], index: 3, kind: input, shape index: {}]   ;;  %s3219_s4 = inlined_call_operand.vmem [shape: f32[4,32], index: 4, kind: input, shape index: {}]   ;;  %s3220_s5 = inlined_call_operand.vmem [shape: f32[12,8], index: 5, kind: input, shape index: {}]   ;;  %s3221_s6 = inlined_call_operand.vmem [shape: f32[144,16], index: 6, kind: input, shape index: {}]   ;;  %s3222_s7 = inlined_call_operand.vmem [shape: f32[80,32], index: 7, kind: input, shape index: {}]   ;;  %s3223_s8 = inlined_call_operand.vmem [shape: f32[160,8], index: 8, kind: input, shape index: {}]   ;;  %s3224_s9 = inlined_call_operand.vmem [shape: f32[16,3], index: 9, kind: output, shape index: {}]  }
   0x1 LB: > { %s2594_s10 = sadd.s32 4294967295, %s2528_s30   ;;  %p2303_p0 = scmp.ge.s32.totalorder %s2528_s30, 1  ;;  %s2528_s30 = sphi %s2588_s30, %s19_s30  }
   0x2   : > { %p305_p1 = scmp.lt.s32.totalorder %s2528_s30, 3 }
   0x4   : > { %p306_p2 = pnand %p2303_p0, %p305_p1 }
   0x5   : > { %s2304_s11 = sshll.u32 (!%p306_p2), %s2594_s10, 1  ;;  %s2530_s16 = smov (!%p306_p2), 4  }
   0x6   : > { %309 = sbr.rel (%p306_p2) target bundleno = 6856 (0x1ac8), region = 56  ;;  %p348_p3 = scmp.lt.s32.totalorder (!%p306_p2), %s2304_s11, 3 }
   0x7   : > { %s2531_s23 = smov (!%p306_p2), 8   ;;  %p353_p4 = scmp.lt.s32.totalorder (!%p306_p2), %s2594_s10, 1 }
   0x8   : > { %s2533_s13 = smov (!%p306_p2), 112   ;;  %s2535_s17 = smov (!%p306_p2), 120  }
   0x9   : > { %s2536_s20 = smov (!%p306_p2), 104  }
   0xb   : > { %s3226_s11 = smov (!%p348_p3, %s2304_s11), 3  ;;  %v451_v2 = vld [vmem:[%s3223_s8] sm:$0xff]  ;;  %v432_v3 = vlaneseq  ;;  %vm402_vm1 = vcmask 31744   ;;  %vm454_vm2 = vcmask 64512   ;;  %v503_v14 = vld [vmem:[%s3223_s8 + $0x10] sm:$0xff]  ;;  %s3228_s10 = smov (!%p353_p4, %s2594_s10), 1 }
   0xc   : > { %s2305_s12 = sshll.u32 %s3226_s11, 3  ;;  %476 = vmatpush.msra.mxu2 %v451_v2  ;;  %527 = vmatpush.msra.mxu3 %v503_v14  ;;  %v2433_v15 = vld [vmem:[%s3220_s5] ss:$0 sm:$0xff]  ;;  %s359_s26 = scalar_lea.vmem %s3217_s2, %s3228_s10  ;;  %vm374_vm3 = vcmask 1044480   ;;  %v502_v27 = vld [vmem:[%s3223_s8 + $0x8] sm:$0xff]  ;;  %vm370_vm4 = vcmask 39936  }
   0xd   : > { %s351_s15 = scalar_lea.vmem %s3215_s0, %s2305_s12  ;;  %v2614_v4 = vshrl.u32 %v432_v3, 7  ;;  %v368_v26 = vld [vmem:[%s3221_s6 + $0x80] sm:$0x1f]  ;;  %vm406_vm5 = vcmask 1043456   ;;  %v538_v29 = vld [vmem:[%s3223_s8 + $0x18] sm:$0xf] }
   0xe   : > { %v2602_v0 = vld [vmem:[%s351_s15] sm:$0xff]  ;;  %v2606_v1 = vld [vmem:[%s351_s15 + $0x8] sm:$0xff]  ;;  %2308 = vmatpush.msk.msra.mxu0 %vm374_vm3, %v368_v26  ;;  %528 = vmatpush.msra.mxu3 %v502_v27  ;;  %vm506_vm6 = vcmask 130048   ;;  %s2306_s21 = sshll.u32 %s3228_s10, 3  ;;  %v645_v14 = vld [vmem:[%s3223_s8 + $0x38] sm:$0xff]  ;;  %s2532_s11 = smov 16  }
   0xf   : > { %443 = vrot.lane.b32.xlu0 %v2602_v0, %s2530_s16  ;;  %v2617_v5 = vrot.slane %v2602_v0, 7  ;;  %v2620_v6 = vrot.slane %v2606_v1, 7  ;;  %vm434_vm0 = vcmp.lt.s32.totalorder %v2614_v4, 1  ;;  %v367_v28 = vld [vmem:[%s359_s26] sm:$0x1]  ;;  %v714_v35 = vld [vmem:[%s3221_s6 + $0x8] sm:$0xff]  ;;  %s356_s25 = scalar_lea.vmem %s3216_s1, %s2306_s21  ;;  %668 = vmatpush.msrb.mxu2 %v645_v14  ;;  %s363_s12 = scalar_lea.vmem %s3224_s9, %s2306_s21 }
  0x10   : > { %2309 = vmatmul.msk.f32.vlgmr.msra.gmra.mxu0 %vm370_vm4, %v367_v28  ;;  %v713_v36 = vld [vmem:[%s3221_s6] sm:$0xff]  ;;  %v369_v37 = vld [vmem:[%s3218_s3 + $0xe] sm:$0x1]  ;;  %v399_v41 = vld [vmem:[%s3221_s6 + $0x88] sm:$0xf]  ;;  %vm577_vm7 = vcmp.lt.s32.totalorder %v2614_v4, 2 }
  0x11   : > { %v436_v7 = vsel %vm434_vm0, %v2620_v6, %v2617_v5  ;;  %v435_v11 = vsel %vm434_vm0, %v2617_v5, %v2620_v6  ;;  %2316 = vmatpush.msk.msrb.mxu0 %vm406_vm5, %v538_v29  ;;  %v2707_v42 = vld [vmem:[%s356_s25] sm:$0xff]  ;;  %v594_v43 = vld [vmem:[%s3223_s8 + $0x28] sm:$0xff]  ;;  %2310 = vmatpush.msk.msra.mxu1 %vm406_vm5, %v399_v41  ;;  %v644_v27 = vld [vmem:[%s3223_s8 + $0x30] sm:$0xff] }
  0x12   : > { %v439_v8 = vsel %vm434_vm0, 0.0, %v436_v7  ;;  %2311 = vmatmul.msk.f32.vlgmr.msra.gmra.mxu1 %vm402_vm1, %v2707_v42  ;;  %v2434_v45 = vld [vmem:[%s3220_s5 + $0x1] ss:$0 sm:$0xff]  ;;  %v2435_v46 = vld [vmem:[%s3220_s5 + $0x2] ss:$0 sm:$0xff]  ;;  %669 = vmatpush.msrb.mxu2 %v644_v27  ;;  %v791_v14 = vld [vmem:[%s3222_s7 + $0x10] sm:$0xff] }
  0x13   : > { %732 = vmatpush.msra.mxu0 %v714_v35  ;;  %617 = vmatpush.msrb.mxu1 %v594_v43  ;;  %v593_v60 = vld [vmem:[%s3223_s8 + $0x20] sm:$0xff] }
  0x14   : > { %v2438_v35 = vld [vmem:[%s3220_s5 + $0x4] ss:$0 sm:$0xff] }
  0x15   : > { %733 = vmatpush.msra.mxu0 %v713_v36  ;;  %618 = vmatpush.msrb.mxu1 %v593_v60 }
  0x17   : > { %445 = vrot.lane.b32.xlu0 %v2606_v1, %s2530_s16 }
  0x18   : > { %2317 = vmatmul.msk.f32.vlgmr.msrb.gmra.mxu0 %vm402_vm1, %v2602_v0 }
  0x19   : > { %814 = vmatpush.msrb.mxu0 %v791_v14 }
  0x20   : > { %2318 = vmatmul.msk.f32.gmra.mxu0 %vm402_vm1, %v2606_v1 }
  0x81   : > { %v2629_v9 = vpop.permute.xlu0 %443 }
  0x82   : > { %v449_v10 = vsel %vm402_vm1, %v439_v8, %v2629_v9 }
  0x83   : > { %2312 = vmatmul.msk.f32.vlgmr.msra.gmra.mxu2 %vm454_vm2, %v449_v10 }
  0x89   : > { %v446_v12 = vpop.permute.xlu0 %445 }
  0x8a   : > { %v2639_v13 = vsel %vm402_vm1, %v435_v11, %v446_v12 }
  0x8b   : > { %2313 = vmatmul.msk.f32.gmra.mxu2 %vm454_vm2, %v2639_v13 }
  0x8d   : > { %v395_v38 = vpop.f32.mrf.mxu0 }
  0x8e   : > { %v2692_v39 = vadd.f32 %v395_v38, %v369_v37 }
  0x90   : > { %v398_v40 = vmax.f32 %v2692_v39, 0.0 }
  0x92   : > { %2325 = vmatmul.msk.f32.vlgmr.msra.gmra.mxu0 %vm506_vm6, %v398_v40 }
  0x95   : > { %v565_v44 = vpop.f32.mrf.mxu0 }
  0x96   : > { %v566_v49 = vadd.f32 %v2435_v46, %v565_v44 }
  0x9d   : > { %v568_v52 = vpop.f32.mrf.mxu0 }
  0x9e   : > { %v569_v56 = vadd.f32 %v2435_v46, %v568_v52 }
 0x106   : > { %v478_v16 = vpop.f32.mrf.mxu2 }
 0x107   : > { %v479_v17 = vadd.f32 %v2433_v15, %v478_v16  ;;  %v2437_v16 = vld [vmem:[%s3220_s5 + $0x3] ss:$0 sm:$0xff] }
 0x109   : > { %v484_v18 = vmax.f32 %v479_v17, 0.0 }
 0x10b   : > { %494 = vrot.lane.b32.xlu1 %v484_v18, %s2531_s23  ;;  %v486_v22 = vrot.slane %v484_v18, 7 }
 0x10e   : > { %v481_v19 = vpop.f32.mrf.mxu2 }
 0x10f   : > { %v482_v20 = vadd.f32 %v2433_v15, %v481_v19  ;;  %v2740_v15 = vpop.f32.mrf.mxu1 }
 0x111   : > { %v485_v21 = vmax.f32 %v482_v20, 0.0 }
 0x113   : > { %v487_v23 = vrot.slane %v485_v21, 7  ;;  %496 = vrot.lane.b32.xlu1 %v485_v21, %s2531_s23 }
 0x115   : > { %v489_v24 = vsel %vm434_vm0, %v487_v23, %v486_v22  ;;  %v488_v25 = vsel %vm434_vm0, %v486_v22, %v487_v23 }
 0x116   : > { %v490_v31 = vsel %vm434_vm0, 0.0, %v489_v24 }
 0x17d   : > { %v495_v30 = vpop.permute.xlu1 %494 }
 0x17e   : > { %v500_v32 = vsel %vm454_vm2, %v490_v31, %v495_v30 }
 0x17f   : > { %2314 = vmatmul.msk.f32.vlgmr.msra.gmra.mxu3 %vm506_vm6, %v500_v32 }
 0x185   : > { %v497_v33 = vpop.permute.xlu1 %496 }
 0x186   : > { %v501_v34 = vsel %vm454_vm2, %v488_v25, %v497_v33  ;;  %v683_v33 = vld [vmem:[%s3222_s7] sm:$0xff] }
 0x187   : > { %2315 = vmatmul.msk.f32.gmra.mxu3 %vm506_vm6, %v501_v34  ;;  %v2439_v34 = vld [vmem:[%s3218_s3 + $0x2] ss:$0 sm:$0xff] }
 0x188   : > { %705 = vmatpush.msrb.mxu3 %v683_v33 }
 0x202   : > { %v530_v47 = vpop.f32.mrf.mxu3 }
 0x203   : > { %v531_v48 = vadd.f32 %v2434_v45, %v530_v47 }
 0x205   : > { %v536_v50 = vmax.f32 %v531_v48, 0.0 }
 0x207   : > { %v571_v51 = vadd.f32 %v566_v49, %v536_v50  ;;  %v758_v49 = vld [vmem:[%s3221_s6 + $0x18] sm:$0xff]  ;;  %v757_v50 = vld [vmem:[%s3221_s6 + $0x10] sm:$0xff] }
 0x208   : > { %781 = vmatpush.msra.mxu1 %v758_v49 }
 0x209   : > { %v573_v53 = vmax.f32 %v571_v51, 0.0  ;;  %v735_v51 = vpop.f32.mrf.mxu0 }
 0x20a   : > { %v533_v54 = vpop.f32.mrf.mxu3  ;;  %782 = vmatpush.msra.mxu1 %v757_v50  ;;  %v738_v52 = vperm.slane %v735_v51, 0 }
 0x20b   : > { %v534_v55 = vadd.f32 %v2434_v45, %v533_v54  ;;  %585 = vrot.lane.b32.xlu2 %v573_v53, %s2531_s23  ;;  %v575_v62 = vrot.slane %v573_v53, 6 }
 0x20d   : > { %v537_v57 = vmax.f32 %v534_v55, 0.0 }
 0x20f   : > { %v572_v58 = vadd.f32 %v569_v56, %v537_v57 }
 0x211   : > { %v574_v59 = vmax.f32 %v572_v58, 0.0 }
 0x213   : > { %587 = vrot.lane.b32.xlu2 %v574_v59, %s2531_s23  ;;  %v576_v61 = vrot.slane %v574_v59, 6 }
 0x215   : > { %v579_v63 = vsel %vm577_vm7, %v576_v61, %v575_v62  ;;  %v578_v11 = vsel %vm577_vm7, %v575_v62, %v576_v61 }
 0x216   : > { %v581_v7 = vsel %vm577_vm7, 0.0, %v579_v63 }
 0x265   : > { %v586_v2 = vpop.permute.xlu2 %585 }
 0x266   : > { %v591_v8 = vsel %vm454_vm2, %v581_v7, %v586_v2 }
 0x267   : > { %2319 = vmatmul.msk.f32.vlgmr.msrb.gmra.mxu1 %vm506_vm6, %v591_v8 }
 0x26d   : > { %v588_v10 = vpop.permute.xlu2 %587 }
 0x26e   : > { %v592_v12 = vsel %vm454_vm2, %v578_v11, %v588_v10 }
 0x26f   : > { %2320 = vmatmul.msk.f32.gmra.mxu1 %vm506_vm6, %v592_v12 }
 0x2e4   : > { %v620_v17 = vpop.f32.mrf.mxu1 }
 0x2e5   : > { %v621_v18 = vadd.f32 %v2437_v16, %v620_v17  ;;  %v2441_v17 = vld [vmem:[%s3218_s3 + $0x1] ss:$0 sm:$0xff] }
 0x2e7   : > { %v626_v19 = vmax.f32 %v621_v18, 0.0 }
 0x2e9   : > { %636 = vrot.lane.b32.xlu0 %v626_v19, %s2531_s23  ;;  %v628_v23 = vrot.slane %v626_v19, 6 }
 0x2ec   : > { %v623_v20 = vpop.f32.mrf.mxu1 }
 0x2ed   : > { %v624_v21 = vadd.f32 %v2437_v16, %v623_v20  ;;  %v790_v16 = vld [vmem:[%s3222_s7 + $0x8] sm:$0xff] }
 0x2ee   : > { %815 = vmatpush.msrb.mxu0 %v790_v16 }
 0x2ef   : > { %v627_v22 = vmax.f32 %v624_v21, 0.0 }
 0x2f1   : > { %v629_v24 = vrot.slane %v627_v22, 6  ;;  %638 = vrot.lane.b32.xlu1 %v627_v22, %s2531_s23  ;;  %v2442_v22 = vld [vmem:[%s3219_s4] ss:$0 sm:$0xff] }
 0x2f3   : > { %v631_v25 = vsel %vm577_vm7, %v629_v24, %v628_v23  ;;  %v630_v26 = vsel %vm577_vm7, %v628_v23, %v629_v24 }
 0x2f4   : > { %v632_v29 = vsel %vm577_vm7, 0.0, %v631_v25 }
 0x2f9   : > { %864 = vrot.lane.b32.xlu1 %v2439_v34, %s2532_s11 }
 0x35b   : > { %v637_v28 = vpop.permute.xlu0 %636 }
 0x35c   : > { %v642_v30 = vsel %vm454_vm2, %v632_v29, %v637_v28 }
 0x35d   : > { %2321 = vmatmul.msk.f32.vlgmr.msrb.gmra.mxu2 %vm506_vm6, %v642_v30 }
 0x363   : > { %v639_v31 = vpop.permute.xlu1 %638 }
 0x364   : > { %v643_v32 = vsel %vm454_vm2, %v630_v26, %v639_v31 }
 0x365   : > { %2322 = vmatmul.msk.f32.gmra.mxu2 %vm506_vm6, %v643_v32 }
 0x3e0   : > { %v671_v36 = vpop.f32.mrf.mxu2 }
 0x3e1   : > { %v672_v37 = vadd.f32 %v2438_v35, %v671_v36 }
 0x3e3   : > { %v677_v38 = vmax.f32 %v672_v37, 0.0 }
 0x3e5   : > { %v679_v41 = vadd.f32 %v677_v38, %v573_v53  ;;  %v2440_v53 = vld [vmem:[%s3218_s3] ss:$0 sm:$0xff] }
 0x3e7   : > { %v681_v43 = vmax.f32 %v679_v41, 0.0 }
 0x3e8   : > { %v674_v44 = vpop.f32.mrf.mxu2 }
 0x3e9   : > { %v675_v45 = vadd.f32 %v2438_v35, %v674_v44  ;;  %2323 = vmatmul.msk.f32.vlgmr.msrb.gmra.mxu3 %vm454_vm2, %v681_v43 }
 0x3eb   : > { %v678_v46 = vmax.f32 %v675_v45, 0.0 }
 0x3ed   : > { %v680_v47 = vadd.f32 %v678_v46, %v574_v59 }
 0x3ef   : > { %v682_v48 = vmax.f32 %v680_v47, 0.0 }
 0x3f1   : > { %2324 = vmatmul.msk.f32.gmra.mxu3 %vm454_vm2, %v682_v48 }
 0x46c   : > { %v2781_v54 = vpop.f32.mrf.mxu3 }
 0x46d   : > { %v739_v55 = vadd.f32 %v738_v52, %v2781_v54 }
 0x46f   : > { %v743_v56 = vadd.f32 %v2440_v53, %v739_v55 }
 0x471   : > { %v747_v57 = vmin.f32 %v743_v56, 0.0  ;;  %vm745_vm8 = vcmp.gt.f32.partialorder %v743_v56, 0.0 }
 0x473   : > { %v749_v58 = vmul.f32 1.442695, %v747_v57 }
 0x474   : > { %v2784_v59 = vpop.f32.mrf.mxu3 }
 0x475   : > { %2464 = vpow2.f32 %v749_v58  ;;  %v740_v60 = vadd.f32 %v738_v52, %v2784_v59 }
 0x477   : > { %v744_v61 = vadd.f32 %v2440_v53, %v740_v60 }
 0x479   : > { %v748_v62 = vmin.f32 %v744_v61, 0.0  ;;  %vm746_vm9 = vcmp.gt.f32.partialorder %v744_v61, 0.0 }
 0x47b   : > { %v2465_v63 = vpop.eup %2464  ;;  %v751_v2 = vmul.f32 1.442695, %v748_v62 }
 0x47c   : > { %v2326_v7 = vadd.f32 -1.0, %v2465_v63 }
 0x47d   : > { %2466 = vpow2.f32 %v751_v2  ;;  %v865_v2 = vpop.permute.xlu1 %864 }
 0x47e   : > { %v755_v8 = vsel %vm745_vm8, %v743_v56, %v2326_v7  ;;  %v867_v7 = vadd.f32 %v865_v2, %v2781_v54 }
 0x47f   : > { %2328 = vmatmul.msk.f32.vlgmr.msra.gmra.mxu1 %vm506_vm6, %v755_v8 }
 0x483   : > { %v2467_v10 = vpop.eup %2466 }
 0x484   : > { %v2327_v11 = vadd.f32 -1.0, %v2467_v10 }
 0x486   : > { %v756_v12 = vsel %vm746_vm9, %v744_v61, %v2327_v11  ;;  %v868_v11 = vadd.f32 %v865_v2, %v2784_v59 }
 0x487   : > { %2329 = vmatmul.msk.f32.gmra.mxu1 %vm506_vm6, %v756_v12 }
 0x4fc   : > { %v784_v18 = vpop.f32.mrf.mxu1 }
 0x4fd   : > { %v785_v19 = vadd.f32 %v2441_v17, %v784_v18 }
 0x4ff   : > { %2330 = vmatmul.msk.f32.vlgmr.msrb.gmra.mxu0 %vm506_vm6, %v785_v19 }
 0x504   : > { %v787_v20 = vpop.f32.mrf.mxu1 }
 0x505   : > { %v788_v21 = vadd.f32 %v2441_v17, %v787_v20  ;;  %v2534_v20 = vmov 16.0  }
 0x507   : > { %2331 = vmatmul.msk.f32.gmra.mxu0 %vm506_vm6, %v788_v21 }
 0x57c   : > { %v817_v23 = vpop.f32.mrf.mxu0 }
 0x57d   : > { %v818_v24 = vadd.f32 %v2442_v22, %v817_v23 }
 0x57f   : > { %871 = vrot.lane.b32.xlu2 %v818_v24, %s2533_s13  ;;  %v823_v27 = vsub.f32 0.0, %v818_v24 }
 0x581   : > { %v825_v28 = vmul.f32 1.442695, %v823_v27 }
 0x583   : > { %2468 = vpow2.f32 %v825_v28 }
 0x584   : > { %v820_v25 = vpop.f32.mrf.mxu0 }
 0x585   : > { %v821_v26 = vadd.f32 %v2442_v22, %v820_v25 }
 0x587   : > { %873 = vrot.lane.b32.xlu0 %v821_v26, %s2533_s13  ;;  %v824_v33 = vsub.f32 0.0, %v821_v26 }
 0x589   : > { %v2469_v29 = vpop.eup %2468  ;;  %v827_v35 = vmul.f32 1.442695, %v824_v33  ;;  %v2443_v33 = vld [vmem:[%s3218_s3 + $0x3] ss:$0 sm:$0xff] }
 0x58a   : > { %v829_v30 = vadd.f32 1.0, %v2469_v29 }
 0x58c   : > { %2470 = vrcp.f32 %v829_v30  ;;  %v842_v38 = vand.u32 2147483648, %v829_v30  ;;  %vm836_vm11 = vweird.f32 %v829_v30  ;;  %v840_v41 = vand.u32 2147483647, %v829_v30 }
 0x58d   : > { %2472 = vpow2.f32 %v827_v35 }
 0x58e   : > { %v843_v45 = vor.u32 1.1754944e-38, %v842_v38  ;;  %vm841_vm13 = vcmp.eq.f32.partialorder %v840_v41, 8.507059e+37 }
 0x592   : > { %v2471_v31 = vpop.eup %2470 }
 0x593   : > { %v832_v32 = vmul.f32 %v2471_v31, %v829_v30  ;;  %vm837_vm10 = vweird.f32 %v2471_v31  ;;  %v2473_v43 = vpop.eup %2472 }
 0x594   : > { %vm838_vm12 = vmor %vm836_vm11, %vm837_vm10  ;;  %v830_v46 = vadd.f32 1.0, %v2473_v43  ;;  %v2444_v43 = vld [vmem:[%s3218_s3 + $0x4] ss:$0 sm:$0xff] }
 0x595   : > { %v833_v34 = vsub.f32 1.0, %v832_v32 }
 0x596   : > { %2474 = vrcp.f32 %v830_v46  ;;  %v857_v56 = vand.u32 2147483648, %v830_v46  ;;  %vm851_vm15 = vweird.f32 %v830_v46  ;;  %v855_v57 = vand.u32 2147483647, %v830_v46 }
 0x597   : > { %v834_v36 = vmul.f32 %v2471_v31, %v833_v34  ;;  %2476 = vrcp.f32 %v2534_v20 }
 0x598   : > { %v858_v60 = vor.u32 1.1754944e-38, %v857_v56  ;;  %vm856_vm4 = vcmp.eq.f32.partialorder %v855_v57, 8.507059e+37 }
 0x599   : > { %v835_v37 = vadd.f32 %v2471_v31, %v834_v36  ;;  %v2436_v36 = vld [vmem:[%s3218_s3 + $0xf] ss:$0 sm:$0xff] }
 0x59b   : > { %v839_v44 = vsel %vm838_vm12, %v2471_v31, %v835_v37  ;;  %v428_v37 = vadd.f32 %v2436_v36, %v2740_v15 }
 0x59c   : > { %v844_v48 = vsel %vm841_vm13, %v843_v45, %v839_v44  ;;  %v2475_v50 = vpop.eup %2474 }
 0x59d   : > { %v847_v51 = vmul.f32 %v2475_v50, %v830_v46  ;;  %vm852_vm14 = vweird.f32 %v2475_v50  ;;  %v2477_v54 = vpop.eup %2476 }
 0x59e   : > { %vm853_vm3 = vmor %vm851_vm15, %vm852_vm14  ;;  %v904_v21 = vmul.f32 16.0, %v2477_v54  ;;  %vm908_vm8 = vweird.f32 %v2477_v54  ;;  %vm1076_vm15 = vcmask 195584  }
 0x59f   : > { %v848_v52 = vsub.f32 1.0, %v847_v51 }
 0x5a0   : > { %v905_v22 = vsub.f32 1.0, %v904_v21  ;;  %v975_v21 = vld [vmem:[%s3221_s6 + $0x20] sm:$0xff] }
 0x5a1   : > { %v849_v53 = vmul.f32 %v2475_v50, %v848_v52 }
 0x5a2   : > { %v906_v23 = vmul.f32 %v2477_v54, %v905_v22 }
 0x5a3   : > { %v850_v55 = vadd.f32 %v2475_v50, %v849_v53 }
 0x5a4   : > { %v907_v24 = vadd.f32 %v2477_v54, %v906_v23 }
 0x5a5   : > { %v854_v58 = vsel %vm853_vm3, %v2475_v50, %v850_v55  ;;  %v1003_v50 = vld [vmem:[%s3222_s7 + $0x18] sm:$0xff] }
 0x5a6   : > { %v859_v62 = vsel %vm856_vm4, %v858_v60, %v854_v58  ;;  %v2813_v59 = vsel %vm908_vm8, %v2477_v54, %v907_v24  ;;  %v976_v54 = vld [vmem:[%s3221_s6 + $0x28] sm:$0xff] }
 0x5a7   : > { %997 = vmatpush.msra.mxu2 %v976_v54  ;;  %v1205_v54 = vld [vmem:[%s3221_s6 + $0x30] sm:$0xff] }
 0x5a9   : > { %998 = vmatpush.msra.mxu2 %v975_v21 }
 0x5d9   : > { %v872_v47 = vpop.permute.xlu2 %871 }
 0x5da   : > { %v877_v49 = vmul.f32 %v872_v47, %v844_v48 }
 0x5dc   : > { %881 = vrot.lane.b32.xlu2 %v877_v49, %s2532_s11  ;;  %v1004_v49 = vld [vmem:[%s3222_s7 + $0x20] sm:$0xff] }
 0x5dd   : > { %1031 = vmatpush.msra.mxu3 %v1004_v49 }
 0x5df   : > { %1032 = vmatpush.msra.mxu3 %v1003_v50 }
 0x5f9   : > { %v874_v61 = vpop.permute.xlu0 %873 }
 0x5fa   : > { %v878_v63 = vmul.f32 %v874_v61, %v859_v62 }
 0x5fc   : > { %883 = vrot.lane.b32.xlu0 %v878_v63, %s2532_s11 }
 0x636   : > { %v882_v8 = vpop.permute.xlu2 %881 }
 0x637   : > { %v887_v10 = vadd.f32 %v882_v8, %v867_v7 }
 0x639   : > { %891 = vrot.lane.b32.xlu1 %v887_v10, %s2533_s13 }
 0x66e   : > { %v884_v12 = vpop.permute.xlu0 %883 }
 0x66f   : > { %v888_v14 = vadd.f32 %v884_v12, %v868_v11 }
 0x671   : > { %893 = vrot.lane.b32.xlu2 %v888_v14, %s2533_s13 }
 0x6ab   : > { %v892_v16 = vpop.permute.xlu1 %891 }
 0x6ac   : > { %v897_v17 = vsel %vm506_vm6, %v892_v16, 0.0 }
 0x6ad   : > { %898 = vadd.xlane.f32.xlu0 %v897_v17 }
 0x6cb   : > { %v894_v18 = vpop.permute.xlu2 %893 }
 0x6cc   : > { %v900_v19 = vsel %vm506_vm6, %v894_v18, 0.0 }
 0x6cd   : > { %901 = vadd.xlane.f32.xlu1 %v900_v19 }
 0x6e6   : > { %959 = vrot.lane.b32.xlu1 %v2443_v33, %s2532_s11  ;;  %v2446_v33 = vld [vmem:[%s3218_s3 + $0x5] ss:$0 sm:$0xff] }
 0x720   : > { %v899_v25 = vpop.xlane.xlu0 %898 }
 0x721   : > { %v910_v26 = vmul.f32 %v2813_v59, %v899_v25  ;;  %v2445_v25 = vld [vmem:[%s3219_s4 + $0x1] ss:$0 sm:$0xff] }
 0x723   : > { %v912_v27 = vsub.f32 %v887_v10, %v910_v26 }
 0x725   : > { %v914_v28 = vmul.f32 %v912_v27, %v912_v27 }
 0x727   : > { %918 = vrot.lane.b32.xlu2 %v914_v28, %s2533_s13 }
 0x740   : > { %v902_v29 = vpop.xlane.xlu1 %901 }
 0x741   : > { %v911_v30 = vmul.f32 %v2813_v59, %v902_v29 }
 0x743   : > { %v913_v31 = vsub.f32 %v888_v14, %v911_v30 }
 0x745   : > { %v915_v32 = vmul.f32 %v913_v31, %v913_v31 }
 0x747   : > { %920 = vrot.lane.b32.xlu2 %v915_v32, %s2533_s13 }
 0x758   : > { %v960_v2 = vpop.permute.xlu1 %959 }
 0x781   : > { %v919_v34 = vpop.permute.xlu2 %918 }
 0x782   : > { %v924_v35 = vsel %vm506_vm6, %v919_v34, 0.0 }
 0x783   : > { %925 = vadd.xlane.f32.xlu2 %v924_v35 }
 0x79b   : > { %973 = vrot.lane.b32.xlu2 %v428_v37, %s2532_s11 }
 0x7a1   : > { %v921_v38 = vpop.permute.xlu2 %920 }
 0x7a2   : > { %v927_v41 = vsel %vm506_vm6, %v921_v38, 0.0 }
 0x7a3   : > { %928 = vadd.xlane.f32.xlu0 %v927_v41 }
 0x7b7   : > { %967 = vrot.lane.b32.xlu0 %v2444_v43, %s2532_s11 }
 0x7f6   : > { %v926_v44 = vpop.xlane.xlu2 %925 }
 0x7f7   : > { %v930_v45 = vmul.f32 %v926_v44, %v2813_v59 }
 0x7f9   : > { %v932_v46 = vadd.f32 1e-05, %v930_v45 }
 0x7fb   : > { %2478 = vrsqrt.f32 %v932_v46  ;;  %vm940_vm10 = vweird.f32 %v932_v46 }
 0x7fe   : > { %v974_v20 = vpop.permute.xlu2 %973 }
 0x801   : > { %v2479_v47 = vpop.eup %2478 }
 0x802   : > { %v935_v48 = vmul.f32 %v2479_v47, %v932_v46  ;;  %vm941_vm9 = vweird.f32 %v2479_v47 }
 0x803   : > { %vm942_vm11 = vmor %vm940_vm10, %vm941_vm9 }
 0x804   : > { %v936_v15 = vmul.f32 %v2479_v47, %v935_v48 }
 0x806   : > { %v937_v51 = vmul.f32 0.5, %v936_v15 }
 0x808   : > { %v938_v55 = vsub.f32 1.5, %v937_v51 }
 0x80a   : > { %v939_v57 = vmul.f32 %v2479_v47, %v938_v55 }
 0x80c   : > { %v943_v60 = vsel %vm942_vm11, %v2479_v47, %v939_v57 }
 0x80d   : > { %v954_v62 = vmul.f32 %v943_v60, %v912_v27 }
 0x80f   : > { %v962_v8 = vmul.f32 %v960_v2, %v954_v62 }
 0x816   : > { %v929_v52 = vpop.xlane.xlu0 %928 }
 0x817   : > { %v931_v53 = vmul.f32 %v929_v52, %v2813_v59 }
 0x819   : > { %v933_v56 = vadd.f32 1e-05, %v931_v53 }
 0x81b   : > { %2480 = vrsqrt.f32 %v933_v56  ;;  %vm950_vm13 = vweird.f32 %v933_v56 }
 0x821   : > { %v2481_v58 = vpop.eup %2480 }
 0x822   : > { %v945_v61 = vmul.f32 %v2481_v58, %v933_v56  ;;  %vm951_vm12 = vweird.f32 %v2481_v58 }
 0x823   : > { %vm952_vm14 = vmor %vm950_vm13, %vm951_vm12 }
 0x824   : > { %v946_v63 = vmul.f32 %v2481_v58, %v945_v61 }
 0x826   : > { %v947_v7 = vmul.f32 0.5, %v946_v63 }
 0x828   : > { %v948_v10 = vsub.f32 1.5, %v947_v7 }
 0x829   : > { %v968_v11 = vpop.permute.xlu0 %967 }
 0x82a   : > { %v949_v12 = vmul.f32 %v2481_v58, %v948_v10  ;;  %v970_v14 = vadd.f32 %v968_v11, %v962_v8 }
 0x82c   : > { %v953_v16 = vsel %vm952_vm14, %v2481_v58, %v949_v12  ;;  %1009 = vrot.lane.b32.xlu1 %v970_v14, %s2533_s13 }
 0x82d   : > { %v955_v17 = vmul.f32 %v953_v16, %v913_v31 }
 0x82f   : > { %v963_v18 = vmul.f32 %v960_v2, %v955_v17 }
 0x831   : > { %v971_v19 = vadd.f32 %v968_v11, %v963_v18 }
 0x833   : > { %1011 = vrot.lane.b32.xlu0 %v971_v19, %s2533_s13  ;;  %v1206_v19 = vld [vmem:[%s3221_s6 + $0x38] sm:$0xff] }
 0x834   : > { %979 = vrot.lane.b32.xlu1 %v974_v20, %s2533_s13 }
 0x89e   : > { %v1010_v22 = vpop.permute.xlu1 %1009 }
 0x89f   : > { %2333 = vmatmul.msk.f32.vlgmr.msra.gmra.mxu3 %vm506_vm6, %v1010_v22 }
 0x8a5   : > { %v1012_v23 = vpop.permute.xlu0 %1011 }
 0x8a6   : > { %v980_v24 = vpop.permute.xlu1 %979 }
 0x8a7   : > { %2332 = vmatmul.msk.f32.vlgmr.msra.gmra.mxu2 %vm506_vm6, %v980_v24  ;;  %2334 = vmatmul.msk.f32.gmra.mxu3 %vm506_vm6, %v1012_v23 }
 0x8af   : > { %2335 = vmatmul.msk.f32.gmra.mxu3 %vm506_vm6, %v980_v24  ;;  %v1233_v24 = vld [vmem:[%s3223_s8 + $0x48] sm:$0xff] }
 0x922   : > { %v1034_v26 = vpop.f32.mrf.mxu3 }
 0x923   : > { %v1035_v27 = vadd.f32 %v2445_v25, %v1034_v26  ;;  %v2447_v26 = vld [vmem:[%s3218_s3 + $0x6] ss:$0 sm:$0xff] }
 0x925   : > { %1122 = vrot.lane.b32.xlu1 %v1035_v27, %s2535_s17 }
 0x92a   : > { %v1037_v28 = vpop.f32.mrf.mxu3  ;;  %v1000_v34 = vpop.f32.mrf.mxu2 }
 0x92b   : > { %v1038_v29 = vadd.f32 %v2445_v25, %v1037_v28  ;;  %v1001_v35 = vadd.f32 %v2446_v33, %v1000_v34  ;;  %v1282_v34 = vld [vmem:[%s3223_s8 + $0x50] sm:$0xff] }
 0x92d   : > { %1124 = vrot.lane.b32.xlu2 %v1038_v29, %s2535_s17 }
 0x932   : > { %v1040_v30 = vpop.f32.mrf.mxu3 }
 0x933   : > { %v1041_v31 = vadd.f32 %v2445_v25, %v1040_v30  ;;  %v1232_v25 = vld [vmem:[%s3223_s8 + $0x40] sm:$0xff]  ;;  %v1386_v30 = vld [vmem:[%s3223_s8 + $0x68] sm:$0xf] }
 0x934   : > { %2354 = vmatpush.msk.msrb.mxu3 %vm406_vm5, %v1386_v30 }
 0x935   : > { %1126 = vrot.lane.b32.xlu0 %v1041_v31, %s2535_s17  ;;  %2336 = vmatpush.xpose.msk.msrb.mxu1 %vm454_vm2, %v1041_v31  ;;  %v2411_v32 = vpack.i.bf16 %v1038_v29, %v1041_v31  ;;  %v2448_v31 = vld [vmem:[%s3220_s5 + $0x5] ss:$0 sm:$0xff] }
 0x936   : > { %2355 = vmatmul.msk.f32.vlgmr.msrb.gmra.mxu3 %vm402_vm1, %v2602_v0  ;;  %v1601_v0 = vld [vmem:[%s3221_s6 + $0x40] sm:$0xff] }
 0x939   : > { %2337 = vmatpush.xpose.msk.msrb.mxu1 %vm454_vm2, %v1038_v29  ;;  %v2537_v29 = vmov 0  }
 0x93a   : > { %2421 = vset.pattern.permute.xlu2 %v2537_v29  ;;  %2432 = vset.pattern.permute.xlu0 %v2537_v29 }
 0x93d   : > { %2338 = vmatpush.xpose.msk.msrb.mxu1 %vm454_vm2, %v1035_v27  ;;  %1120 = vrot.lane.b32.xlu0 %v1001_v35, %s2535_s17 }
 0x93e   : > { %2356 = vmatmul.msk.f32.gmra.mxu3 %vm402_vm1, %v2606_v1  ;;  %v2923_v1 = vand.u32 127, %v432_v3 }
 0x940   : > { %2339 = vmatmul.msk.f32.vlgmr.msrb.gmra.mxu1 %vm454_vm2, %v1001_v35  ;;  %v1602_v35 = vld [vmem:[%s3221_s6 + $0x48] sm:$0xff]  ;;  %vm1261_vm5 = vcmp.eq.s32.totalorder %v2923_v1, 0 }
 0x941   : > { %1617 = vmatpush.msra.mxu3 %v1602_v35 }
 0x943   : > { %1618 = vmatpush.msra.mxu3 %v1601_v0 }
 0x987   : > { %v1125_v37 = vpop.permute.xlu2 %1124 }
 0x997   : > { %v1123_v38 = vpop.permute.xlu1 %1122 }
 0x9a7   : > { %v1127_v36 = vpop.permute.xlu0 %1126 }
 0x9a8   : > { %2341 = vmatpush.xpose.msk.msra.mxu0 %vm454_vm2, %v1127_v36 }
 0x9ac   : > { %2342 = vmatpush.xpose.msk.msra.mxu0 %vm454_vm2, %v1125_v37 }
 0x9af   : > { %v1121_v41 = vpop.permute.xlu0 %1120 }
 0x9b0   : > { %2343 = vmatpush.xpose.msk.msra.mxu0 %vm454_vm2, %v1123_v38 }
 0x9b3   : > { %2344 = vmatmul.msk.f32.vlgmr.msra.gmra.mxu0 %vm454_vm2, %v1121_v41 }
 0x9b4   : > { %1253 = vmatpush.msrb.mxu0 %v1233_v24 }
 0x9b6   : > { %1254 = vmatpush.msrb.mxu0 %v1232_v25 }
 0x9bd   : > { %v1072_v43 = vpop.f32.mrf.mxu1 }
 0x9be   : > { %v1075_v44 = vmul.f32 0.35355338, %v1072_v43 }
 0x9c0   : > { %v1077_v45 = vsel %vm1076_vm15, %v1075_v44, -inf }
 0x9c1   : > { %1078 = vmax.xlane.f32.xlu1 %v1077_v45 }
 0x9da   : > { %1168 = vrot.lane.b32.xlu1 %v1035_v27, %s2536_s20 }
 0xa30   : > { %v1153_v46 = vpop.f32.mrf.mxu0 }
 0xa31   : > { %v1156_v47 = vmul.f32 0.35355338, %v1153_v46 }
 0xa33   : > { %v1157_v48 = vsel %vm1076_vm15, %v1156_v47, -inf }
 0xa34   : > { %1158 = vmax.xlane.f32.xlu2 %v1157_v48  ;;  %v1079_v15 = vpop.xlane.xlu1 %1078 }
 0xa35   : > { %v1080_v49 = vsub.f32 %v1075_v44, %v1079_v15  ;;  %v1344_v15 = vld [vmem:[%s3223_s8 + $0x58] sm:$0xff] }
 0xa37   : > { %v1081_v50 = vmul.f32 1.442695, %v1080_v49 }
 0xa39   : > { %2482 = vpow2.f32 %v1081_v50 }
 0xa3f   : > { %v2483_v51 = vpop.eup %2482 }
 0xa40   : > { %v1083_v52 = vsel %vm1076_vm15, %v2483_v51, 0.0 }
 0xa41   : > { %1084 = vadd.xlane.f32.xlu0 %v1083_v52 }
 0xa4c   : > { %2412 = vrot.lane.b32.xlu2 %v2411_v32, %s2536_s20  ;;  %v1169_v63 = vpop.permute.xlu1 %1168 }
 0xa54   : > { %1088 = vrot.lane.b32.xlu2 %v1035_v27, %s2533_s13 }
 0xaa7   : > { %v1159_v53 = vpop.xlane.xlu2 %1158 }
 0xaa8   : > { %v1160_v55 = vsub.f32 %v1156_v47, %v1159_v53 }
 0xaaa   : > { %v1161_v56 = vmul.f32 1.442695, %v1160_v55 }
 0xaac   : > { %2484 = vpow2.f32 %v1161_v56 }
 0xaaf   : > { %v2413_v57 = vpop.permute.xlu2 %2412 }
 0xab0   : > { %v2414_v58 = vunpack.i.l.bf16 %v2413_v57  ;;  %v2415_v61 = vunpack.i.h.bf16 %v2413_v57 }
 0xab2   : > { %v2485_v60 = vpop.eup %2484  ;;  %1193 = vmatpush.msra.mxu1 %v2414_v58 }
 0xab3   : > { %v1163_v62 = vsel %vm1076_vm15, %v2485_v60, 0.0 }
 0xab4   : > { %1194 = vmatpush.msra.mxu1 %v2415_v61  ;;  %1164 = vadd.xlane.f32.xlu0 %v1163_v62  ;;  %v1085_v2 = vpop.xlane.xlu0 %1084 }
 0xab6   : > { %1195 = vmatpush.msra.mxu1 %v1169_v63 }
 0xab7   : > { %v1089_v18 = vpop.permute.xlu2 %1088 }
 0xab8   : > { %1306 = vmatpush.msrb.mxu1 %v1282_v34 }
 0xac8   : > { %2417 = vrot.lane.b32.xlu0 %v2411_v32, %s2533_s13 }
 0xb27   : > { %v1165_v7 = vpop.xlane.xlu0 %1164 }
 0xb28   : > { %2486 = vrcp.f32 %v1165_v7 }
 0xb29   : > { %2488 = vrcp.f32 %v1085_v2 }
 0xb2e   : > { %v2487_v8 = vpop.eup %2486 }
 0xb2f   : > { %v1167_v10 = vmul.f32 %v2487_v8, %v2485_v60  ;;  %v2489_v14 = vpop.eup %2488 }
 0xb30   : > { %v1087_v17 = vmul.f32 %v2489_v14, %v2483_v51 }
 0xb31   : > { %2345 = vmatmul.msk.f32.vlgmr.msra.gmra.mxu1 %vm1076_vm15, %v1167_v10  ;;  %v2451_v10 = vld [vmem:[%s3220_s5 + $0x7] ss:$0 sm:$0xff] }
 0xb3a   : > { %v2418_v11 = vpop.permute.xlu0 %2417 }
 0xb3b   : > { %v2419_v12 = vunpack.i.l.bf16 %v2418_v11  ;;  %v2420_v16 = vunpack.i.h.bf16 %v2418_v11  ;;  %v1411_v11 = vpop.f32.mrf.mxu3 }
 0xb3d   : > { %1113 = vmatpush.msrb.mxu2 %v2419_v12  ;;  %v2449_v12 = vld [vmem:[%s3220_s5 + $0x8] ss:$0 sm:$0xff] }
 0xb3f   : > { %1114 = vmatpush.msrb.mxu2 %v2420_v16  ;;  %v1412_v16 = vadd.f32 %v2449_v12, %v1411_v11 }
 0xb41   : > { %1115 = vmatpush.msrb.mxu2 %v1089_v18 }
 0xb42   : > { %2340 = vmatmul.msk.f32.vlgmr.msrb.gmra.mxu2 %vm1076_vm15, %v1087_v17 }
 0xb43   : > { %1226 = vmatpush.msra.mxu2 %v1206_v19 }
 0xb45   : > { %1227 = vmatpush.msra.mxu2 %v1205_v54  ;;  %v1414_v54 = vpop.f32.mrf.mxu3 }
 0xbae   : > { %v1197_v20 = vpop.f32.mrf.mxu1 }
 0xbaf   : > { %1201 = vrot.lane.b32.xlu1 %v1197_v20, %s2531_s23 }
 0xbc5   : > { %v1117_v21 = vpop.f32.mrf.mxu2 }
 0xc21   : > { %v1202_v22 = vpop.permute.xlu1 %1201 }
 0xc22   : > { %v1204_v23 = vsel %vm454_vm2, %v1117_v21, %v1202_v22  ;;  %v1415_v22 = vadd.f32 %v2449_v12, %v1414_v54 }
 0xc23   : > { %2346 = vmatmul.msk.f32.vlgmr.msra.gmra.mxu2 %vm506_vm6, %v1204_v23 }
 0xca6   : > { %v1229_v27 = vpop.f32.mrf.mxu2 }
 0xca7   : > { %v1230_v28 = vadd.f32 %v2447_v26, %v1229_v27  ;;  %v1452_v27 = vld [vmem:[%s3223_s8 + $0x78] sm:$0xff] }
 0xca8   : > { %1478 = vmatpush.msra.mxu0 %v1452_v27 }
 0xca9   : > { %2347 = vmatmul.msk.f32.vlgmr.msrb.gmra.mxu0 %vm506_vm6, %v1230_v28  ;;  %v1451_v28 = vld [vmem:[%s3223_s8 + $0x70] sm:$0xff] }
 0xcaa   : > { %1479 = vmatpush.msra.mxu0 %v1451_v28 }
 0xd26   : > { %v1256_v32 = vpop.f32.mrf.mxu0 }
 0xd27   : > { %v1257_v33 = vadd.f32 %v2448_v31, %v1256_v32 }
 0xd29   : > { %1264 = vperm.xlu2 %2421, %v1257_v33  }
 0xd83   : > { %v2926_v36 = vpop.permute.xlu2 %1264 }
 0xd84   : > { %v1267_v37 = vsel %vm1261_vm5, %v2926_v36, 0.0 }
 0xd85   : > { %v1268_v38 = vadd.f32 %v1267_v37, %v2707_v42 }
 0xd87   : > { %v1269_v41 = vrot.slane %v1268_v38, 7  ;;  %1277 = vrot.lane.b32.xlu0 %v1268_v38, %s2530_s16  ;;  %2357 = vmatmul.msk.f32.gmra.mxu3 %vm402_vm1, %v1268_v38 }
 0xd89   : > { %v1271_v43 = vsel %vm434_vm0, %v1269_v41, %v2617_v5  ;;  %v1270_v5 = vsel %vm434_vm0, %v2620_v6, %v1269_v41  ;;  %v1345_v6 = vld [vmem:[%s3223_s8 + $0x60] sm:$0xff] }
 0xd8a   : > { %v1274_v3 = vsel %vm434_vm0, 0.0, %v1271_v43  ;;  %1371 = vmatpush.msrb.mxu2 %v1345_v6 }
 0xd8b   : > { %v1280_v44 = vsel %vm402_vm1, %v1274_v3, %v2629_v9  ;;  %v2450_v9 = vld [vmem:[%s3220_s5 + $0x6] ss:$0 sm:$0xff] }
 0xd8c   : > { %2348 = vmatmul.msk.f32.vlgmr.msrb.gmra.mxu1 %vm454_vm2, %v1280_v44  ;;  %1372 = vmatpush.msrb.mxu2 %v1344_v15 }
 0xd8f   : > { %2367 = vmatmul.msk.f32.vlgmr.msra.gmra.mxu3 %vm506_vm6, %v398_v40 }
 0xd94   : > { %2349 = vmatmul.msk.f32.gmra.mxu1 %vm454_vm2, %v2639_v13 }
 0xdf9   : > { %v1278_v42 = vpop.permute.xlu0 %1277 }
 0xdfa   : > { %v1281_v45 = vsel %vm402_vm1, %v1270_v5, %v1278_v42 }
 0xdfb   : > { %2350 = vmatmul.msk.f32.gmra.mxu1 %vm454_vm2, %v1281_v45 }
 0xe09   : > { %v1308_v46 = vpop.f32.mrf.mxu1 }
 0xe0a   : > { %v1309_v39 = vadd.f32 %v2450_v9, %v1308_v46  ;;  %v1417_v29 = vpop.f32.mrf.mxu3 }
 0xe0b   : > { %v1418_v32 = vadd.f32 %v2449_v12, %v1417_v29 }
 0xe0c   : > { %v1317_v47 = vmax.f32 %v1309_v39, 0.0 }
 0xe0e   : > { %1332 = vrot.lane.b32.xlu1 %v1317_v47, %s2531_s23  ;;  %v1320_v52 = vrot.slane %v1317_v47, 7  ;;  %v2452_v47 = vld [vmem:[%s3220_s5 + $0x9] ss:$0 sm:$0xff] }
 0xe11   : > { %v1311_v40 = vpop.f32.mrf.mxu1 }
 0xe12   : > { %v1312_v13 = vadd.f32 %v2450_v9, %v1311_v40 }
 0xe14   : > { %v1318_v48 = vmax.f32 %v1312_v13, 0.0 }
 0xe16   : > { %1334 = vrot.lane.b32.xlu2 %v1318_v48, %s2531_s23  ;;  %v1321_v60 = vrot.slane %v1318_v48, 7 }
 0xe18   : > { %v1324_v62 = vsel %vm434_vm0, %v1320_v52, %v1321_v60 }
 0xe70   : > { %v1335_v61 = vpop.permute.xlu2 %1334 }
 0xe71   : > { %v1342_v63 = vsel %vm454_vm2, %v1324_v62, %v1335_v61 }
 0xe78   : > { %v1314_v49 = vpop.f32.mrf.mxu1 }
 0xe79   : > { %v1315_v50 = vadd.f32 %v2450_v9, %v1314_v49 }
 0xe7b   : > { %v1319_v51 = vmax.f32 %v1315_v50, 0.0  ;;  %v1518_v50 = vld [vmem:[%s3223_s8 + $0x88] sm:$0xff] }
 0xe7c   : > { %1544 = vmatpush.msra.mxu1 %v1518_v50 }
 0xe7d   : > { %v1322_v53 = vrot.slane %v1319_v51, 7  ;;  %1336 = vrot.lane.b32.xlu0 %v1319_v51, %s2531_s23  ;;  %v1517_v51 = vld [vmem:[%s3223_s8 + $0x80] sm:$0xff] }
 0xe7e   : > { %1545 = vmatpush.msra.mxu1 %v1517_v51 }
 0xe7f   : > { %v1325_v55 = vsel %vm434_vm0, %v1322_v53, %v1320_v52  ;;  %v1323_v7 = vsel %vm434_vm0, %v1321_v60, %v1322_v53 }
 0xe80   : > { %v1333_v56 = vpop.permute.xlu1 %1332  ;;  %v1326_v57 = vsel %vm434_vm0, 0.0, %v1325_v55 }
 0xe81   : > { %v1341_v58 = vsel %vm454_vm2, %v1326_v57, %v1333_v56 }
 0xe82   : > { %2351 = vmatmul.msk.f32.vlgmr.msrb.gmra.mxu2 %vm506_vm6, %v1341_v58 }
 0xe8a   : > { %2352 = vmatmul.msk.f32.gmra.mxu2 %vm506_vm6, %v1342_v63 }
 0xeef   : > { %v1337_v2 = vpop.permute.xlu0 %1336 }
 0xef0   : > { %v1343_v8 = vsel %vm454_vm2, %v1323_v7, %v1337_v2 }
 0xef1   : > { %2353 = vmatmul.msk.f32.gmra.mxu2 %vm506_vm6, %v1343_v8 }
 0xf05   : > { %v1374_v14 = vpop.f32.mrf.mxu2 }
 0xf06   : > { %v1375_v17 = vadd.f32 %v2451_v10, %v1374_v14 }
 0xf08   : > { %v1383_v18 = vmax.f32 %v1375_v17, 0.0 }
 0xf0a   : > { %v1420_v19 = vadd.f32 %v1412_v16, %v1383_v18  ;;  %v2453_v16 = vld [vmem:[%s3220_s5 + $0xa] ss:$0 sm:$0xff] }
 0xf0c   : > { %v2982_v20 = vmax.f32 %v1420_v19, 0.0 }
 0xf0d   : > { %v1377_v21 = vpop.f32.mrf.mxu2 }
 0xf0e   : > { %v1378_v23 = vadd.f32 %v2451_v10, %v1377_v21  ;;  %1439 = vrot.lane.b32.xlu1 %v2982_v20, %s2531_s23  ;;  %v1426_v0 = vrot.slane %v2982_v20, 6 }
 0xf10   : > { %v1384_v24 = vmax.f32 %v1378_v23, 0.0 }
 0xf12   : > { %v1421_v25 = vadd.f32 %v1415_v22, %v1384_v24 }
 0xf14   : > { %v2986_v26 = vmax.f32 %v1421_v25, 0.0 }
 0xf16   : > { %1441 = vrot.lane.b32.xlu2 %v2986_v26, %s2531_s23  ;;  %v1427_v44 = vrot.slane %v2986_v26, 6 }
 0xf18   : > { %v1430_v5 = vsel %vm577_vm7, %v1426_v0, %v1427_v44 }
 0xf70   : > { %v1442_v42 = vpop.permute.xlu2 %1441 }
 0xf71   : > { %v1449_v45 = vsel %vm454_vm2, %v1430_v5, %v1442_v42 }
 0xf74   : > { %v1380_v30 = vpop.f32.mrf.mxu2 }
 0xf75   : > { %v1381_v31 = vadd.f32 %v2451_v10, %v1380_v30  ;;  %v1565_v10 = vld [vmem:[%s3222_s7 + $0x28] sm:$0xff] }
 0xf76   : > { %1590 = vmatpush.msra.mxu2 %v1565_v10  ;;  %v2457_v10 = vld [vmem:[%s3218_s3 + $0x9] ss:$0 sm:$0xff] }
 0xf77   : > { %v1385_v33 = vmax.f32 %v1381_v31, 0.0 }
 0xf79   : > { %v1422_v34 = vadd.f32 %v1418_v32, %v1385_v33  ;;  %v1650_v32 = vld [vmem:[%s3221_s6 + $0x50] sm:$0xff] }
 0xf7b   : > { %v2996_v35 = vmax.f32 %v1422_v34, 0.0  ;;  %v2454_v34 = vld [vmem:[%s3218_s3 + $0x7] ss:$0 sm:$0xff] }
 0xf7d   : > { %v1428_v37 = vrot.slane %v2996_v35, 6  ;;  %1443 = vrot.lane.b32.xlu0 %v2996_v35, %s2531_s23 }
 0xf7f   : > { %v1431_v38 = vsel %vm577_vm7, %v1428_v37, %v1426_v0  ;;  %v1429_v46 = vsel %vm577_vm7, %v1427_v44, %v1428_v37 }
 0xf80   : > { %v1440_v41 = vpop.permute.xlu1 %1439  ;;  %v1433_v43 = vsel %vm577_vm7, 0.0, %v1431_v38 }
 0xf81   : > { %v1448_v3 = vsel %vm454_vm2, %v1433_v43, %v1440_v41 }
 0xf82   : > { %2358 = vmatmul.msk.f32.vlgmr.msra.gmra.mxu0 %vm506_vm6, %v1448_v3 }
 0xf8a   : > { %2359 = vmatmul.msk.f32.gmra.mxu0 %vm506_vm6, %v1449_v45 }
 0xfef   : > { %v1444_v9 = vpop.permute.xlu0 %1443 }
 0xff0   : > { %v1450_v39 = vsel %vm454_vm2, %v1429_v46, %v1444_v9 }
 0xff1   : > { %2360 = vmatmul.msk.f32.gmra.mxu0 %vm506_vm6, %v1450_v39 }
 0xfff   : > { %v1481_v40 = vpop.f32.mrf.mxu0 }
0x1000   : > { %v1482_v13 = vadd.f32 %v2452_v47, %v1481_v40 }
0x1002   : > { %v1490_v48 = vmax.f32 %v1482_v13, 0.0 }
0x1004   : > { %1505 = vrot.lane.b32.xlu1 %v1490_v48, %s2531_s23  ;;  %v1493_v56 = vrot.slane %v1490_v48, 6  ;;  %v1690_v48 = vld [vmem:[%s3222_s7 + $0x38] sm:$0xff] }
0x1005   : > { %1716 = vmatpush.msrb.mxu3 %v1690_v48 }
0x1007   : > { %v1484_v6 = vpop.f32.mrf.mxu0 }
0x1008   : > { %v1485_v15 = vadd.f32 %v2452_v47, %v1484_v6 }
0x100a   : > { %v1491_v49 = vmax.f32 %v1485_v15, 0.0  ;;  %v1689_v15 = vld [vmem:[%s3222_s7 + $0x30] sm:$0xff] }
0x100b   : > { %1717 = vmatpush.msrb.mxu3 %v1689_v15 }
0x100c   : > { %1507 = vrot.lane.b32.xlu2 %v1491_v49, %s2531_s23  ;;  %v1494_v63 = vrot.slane %v1491_v49, 6 }
0x100e   : > { %v1497_v7 = vsel %vm577_vm7, %v1493_v56, %v1494_v63 }
0x1066   : > { %v1508_v2 = vpop.permute.xlu2 %1507 }
0x1067   : > { %v1515_v8 = vsel %vm454_vm2, %v1497_v7, %v1508_v2  ;;  %v2456_v2 = vld [vmem:[%s3219_s4 + $0x2] ss:$0 sm:$0xff] }
0x106e   : > { %v1487_v52 = vpop.f32.mrf.mxu0 }
0x106f   : > { %v1488_v53 = vadd.f32 %v2452_v47, %v1487_v52 }
0x1071   : > { %v1492_v55 = vmax.f32 %v1488_v53, 0.0 }
0x1073   : > { %v1495_v57 = vrot.slane %v1492_v55, 6  ;;  %1509 = vrot.lane.b32.xlu0 %v1492_v55, %s2531_s23 }
0x1075   : > { %v1498_v58 = vsel %vm577_vm7, %v1495_v57, %v1493_v56  ;;  %v1496_v12 = vsel %vm577_vm7, %v1494_v63, %v1495_v57  ;;  %v2455_v56 = vld [vmem:[%s3218_s3 + $0x8] ss:$0 sm:$0xff] }
0x1076   : > { %v1506_v60 = vpop.permute.xlu1 %1505  ;;  %v1499_v61 = vsel %vm577_vm7, 0.0, %v1498_v58 }
0x1077   : > { %v1514_v62 = vsel %vm454_vm2, %v1499_v61, %v1506_v60 }
0x1078   : > { %2361 = vmatmul.msk.f32.vlgmr.msra.gmra.mxu1 %vm506_vm6, %v1514_v62 }
0x1080   : > { %2362 = vmatmul.msk.f32.gmra.mxu1 %vm506_vm6, %v1515_v8 }
0x10e5   : > { %v1510_v11 = vpop.permute.xlu0 %1509 }
0x10e6   : > { %v1516_v14 = vsel %vm454_vm2, %v1496_v12, %v1510_v11 }
0x10e7   : > { %2363 = vmatmul.msk.f32.gmra.mxu1 %vm506_vm6, %v1516_v14 }
0x10f5   : > { %v1547_v17 = vpop.f32.mrf.mxu1 }
0x10f6   : > { %v1548_v18 = vadd.f32 %v2453_v16, %v1547_v17 }
0x10f8   : > { %v1556_v19 = vmax.f32 %v1548_v18, 0.0 }
0x10fa   : > { %v1559_v54 = vadd.f32 %v1556_v19, %v2982_v20  ;;  %v1651_v20 = vld [vmem:[%s3221_s6 + $0x58] sm:$0xff] }
0x10fb   : > { %1677 = vmatpush.msrb.mxu0 %v1651_v20 }
0x10fc   : > { %v1562_v21 = vmax.f32 %v1559_v54, 0.0 }
0x10fd   : > { %v1550_v22 = vpop.f32.mrf.mxu1  ;;  %1678 = vmatpush.msrb.mxu0 %v1650_v32 }
0x10fe   : > { %v1551_v23 = vadd.f32 %v2453_v16, %v1550_v22  ;;  %2364 = vmatmul.msk.f32.vlgmr.msra.gmra.mxu2 %vm454_vm2, %v1562_v21 }
0x1100   : > { %v1557_v4 = vmax.f32 %v1551_v23, 0.0 }
0x1102   : > { %v1560_v24 = vadd.f32 %v1557_v4, %v2986_v26  ;;  %v1620_v26 = vpop.f32.mrf.mxu3 }
0x1103   : > { %v1623_v33 = vperm.slane %v1620_v26, 0 }
0x1104   : > { %v1563_v25 = vmax.f32 %v1560_v24, 0.0 }
0x1106   : > { %2365 = vmatmul.msk.f32.gmra.mxu2 %vm454_vm2, %v1563_v25 }
0x1164   : > { %v1553_v27 = vpop.f32.mrf.mxu1 }
0x1165   : > { %v1554_v28 = vadd.f32 %v2453_v16, %v1553_v27 }
0x1167   : > { %v1558_v29 = vmax.f32 %v1554_v28, 0.0 }
0x1169   : > { %v1561_v30 = vadd.f32 %v1558_v29, %v2996_v35 }
0x116b   : > { %v1564_v31 = vmax.f32 %v1561_v30, 0.0 }
0x116d   : > { %2366 = vmatmul.msk.f32.gmra.mxu2 %vm454_vm2, %v1564_v31 }
0x1181   : > { %v3064_v35 = vpop.f32.mrf.mxu2 }
0x1182   : > { %v1624_v0 = vadd.f32 %v1623_v33, %v3064_v35 }
0x1184   : > { %v1629_v37 = vadd.f32 %v2454_v34, %v1624_v0 }
0x1186   : > { %v1635_v38 = vmin.f32 %v1629_v37, 0.0  ;;  %vm1632_vm0 = vcmp.gt.f32.partialorder %v1629_v37, 0.0 }
0x1188   : > { %v1638_v41 = vmul.f32 1.442695, %v1635_v38 }
0x1189   : > { %v3067_v43 = vpop.f32.mrf.mxu2 }
0x118a   : > { %2490 = vpow2.f32 %v1638_v41  ;;  %v1625_v3 = vadd.f32 %v1623_v33, %v3067_v43 }
0x118c   : > { %v1630_v44 = vadd.f32 %v2454_v34, %v1625_v3 }
0x118e   : > { %v1636_v42 = vmin.f32 %v1630_v44, 0.0  ;;  %vm1633_vm1 = vcmp.gt.f32.partialorder %v1630_v44, 0.0 }
0x1190   : > { %v2491_v5 = vpop.eup %2490  ;;  %v1640_v45 = vmul.f32 1.442695, %v1636_v42 }
0x1191   : > { %v2368_v9 = vadd.f32 -1.0, %v2491_v5 }
0x1192   : > { %2492 = vpow2.f32 %v1640_v45 }
0x1193   : > { %v1647_v46 = vsel %vm1632_vm0, %v1629_v37, %v2368_v9 }
0x1194   : > { %2371 = vmatmul.msk.f32.vlgmr.msrb.gmra.mxu0 %vm506_vm6, %v1647_v46 }
0x1198   : > { %v2493_v39 = vpop.eup %2492 }
0x1199   : > { %v2369_v47 = vadd.f32 -1.0, %v2493_v39 }
0x119b   : > { %v1648_v40 = vsel %vm1633_vm1, %v1630_v44, %v2369_v47 }
0x119c   : > { %2372 = vmatmul.msk.f32.gmra.mxu0 %vm506_vm6, %v1648_v40 }
0x11f0   : > { %v3072_v13 = vpop.f32.mrf.mxu2 }
0x11f1   : > { %v1626_v6 = vadd.f32 %v1623_v33, %v3072_v13 }
0x11f3   : > { %v1631_v49 = vadd.f32 %v2454_v34, %v1626_v6 }
0x11f5   : > { %v1637_v50 = vmin.f32 %v1631_v49, 0.0  ;;  %vm1634_vm7 = vcmp.gt.f32.partialorder %v1631_v49, 0.0 }
0x11f7   : > { %v1642_v51 = vmul.f32 1.442695, %v1637_v50 }
0x11f9   : > { %2494 = vpow2.f32 %v1642_v51 }
0x11ff   : > { %v2495_v52 = vpop.eup %2494 }
0x1200   : > { %v2370_v53 = vadd.f32 -1.0, %v2495_v52 }
0x1202   : > { %v1649_v55 = vsel %vm1634_vm7, %v1631_v49, %v2370_v53 }
0x1203   : > { %2373 = vmatmul.msk.f32.gmra.mxu0 %vm506_vm6, %v1649_v55 }
0x1211   : > { %v1680_v57 = vpop.f32.mrf.mxu0 }
0x1212   : > { %v1681_v58 = vadd.f32 %v2455_v56, %v1680_v57 }
0x1214   : > { %2374 = vmatmul.msk.f32.vlgmr.msrb.gmra.mxu3 %vm506_vm6, %v1681_v58 }
0x1219   : > { %v1683_v60 = vpop.f32.mrf.mxu0 }
0x121a   : > { %v1684_v61 = vadd.f32 %v2455_v56, %v1683_v60 }
0x121c   : > { %2375 = vmatmul.msk.f32.gmra.mxu3 %vm506_vm6, %v1684_v61 }
0x1280   : > { %v1686_v62 = vpop.f32.mrf.mxu0 }
0x1281   : > { %v1687_v63 = vadd.f32 %v2455_v56, %v1686_v62 }
0x1283   : > { %2376 = vmatmul.msk.f32.gmra.mxu3 %vm506_vm6, %v1687_v63 }
0x1297   : > { %v1719_v7 = vpop.f32.mrf.mxu3 }
0x1298   : > { %v1720_v8 = vadd.f32 %v2456_v2, %v1719_v7 }
0x129a   : > { %1797 = vrot.lane.b32.xlu1 %v1720_v8, %s2533_s13  ;;  %v1728_v14 = vsub.f32 0.0, %v1720_v8 }
0x129c   : > { %v1731_v17 = vmul.f32 1.442695, %v1728_v14 }
0x129e   : > { %2496 = vpow2.f32 %v1731_v17 }
0x129f   : > { %v1722_v11 = vpop.f32.mrf.mxu3 }
0x12a0   : > { %v1723_v12 = vadd.f32 %v2456_v2, %v1722_v11 }
0x12a2   : > { %1788 = vrot.lane.b32.xlu1 %v2457_v10, %s2532_s11  ;;  %1799 = vrot.lane.b32.xlu2 %v1723_v12, %s2533_s13  ;;  %v1729_v16 = vsub.f32 0.0, %v1723_v12 }
0x12a4   : > { %v1733_v18 = vmul.f32 1.442695, %v1729_v16  ;;  %v2497_v19 = vpop.eup %2496 }
0x12a5   : > { %v1737_v21 = vadd.f32 1.0, %v2497_v19 }
0x12a6   : > { %2498 = vpow2.f32 %v1733_v18 }
0x12a7   : > { %2500 = vrcp.f32 %v1737_v21  ;;  %vm1745_vm4 = vweird.f32 %v1737_v21  ;;  %v1751_v32 = vand.u32 2147483648, %v1737_v21  ;;  %v1749_v34 = vand.u32 2147483647, %v1737_v21 }
0x12a9   : > { %v1752_v41 = vor.u32 1.1754944e-38, %v1751_v32  ;;  %vm1750_vm12 = vcmp.eq.f32.partialorder %v1749_v34, 8.507059e+37 }
0x12ac   : > { %v2499_v54 = vpop.eup %2498 }
0x12ad   : > { %v1738_v22 = vadd.f32 1.0, %v2499_v54  ;;  %v2501_v23 = vpop.eup %2500 }
0x12ae   : > { %v1741_v24 = vmul.f32 %v2501_v23, %v1737_v21  ;;  %vm1746_vm3 = vweird.f32 %v2501_v23 }
0x12af   : > { %2502 = vrcp.f32 %v1738_v22  ;;  %v1766_v0 = vand.u32 2147483648, %v1738_v22  ;;  %vm1747_vm9 = vmor %vm1745_vm4, %vm1746_vm3  ;;  %vm1760_vm10 = vweird.f32 %v1738_v22  ;;  %v1764_v37 = vand.u32 2147483647, %v1738_v22 }
0x12b0   : > { %v1742_v27 = vsub.f32 1.0, %v1741_v24 }
0x12b1   : > { %v1767_v42 = vor.u32 1.1754944e-38, %v1766_v0  ;;  %vm1765_vm13 = vcmp.eq.f32.partialorder %v1764_v37, 8.507059e+37  ;;  %v2459_v0 = vld [vmem:[%s3218_s3 + $0xb] ss:$0 sm:$0xff] }
0x12b2   : > { %v1743_v29 = vmul.f32 %v2501_v23, %v1742_v27 }
0x12b4   : > { %v1744_v31 = vadd.f32 %v2501_v23, %v1743_v29 }
0x12b5   : > { %v2503_v4 = vpop.eup %2502 }
0x12b6   : > { %v1756_v25 = vmul.f32 %v2503_v4, %v1738_v22  ;;  %vm1761_vm8 = vweird.f32 %v2503_v4  ;;  %v1748_v38 = vsel %vm1747_vm9, %v2501_v23, %v1744_v31 }
0x12b7   : > { %vm1762_vm11 = vmor %vm1760_vm10, %vm1761_vm8  ;;  %v1753_v45 = vsel %vm1750_vm12, %v1752_v41, %v1748_v38 }
0x12b8   : > { %v1757_v28 = vsub.f32 1.0, %v1756_v25 }
0x12ba   : > { %v1758_v30 = vmul.f32 %v2503_v4, %v1757_v28 }
0x12bc   : > { %v1759_v26 = vadd.f32 %v2503_v4, %v1758_v30  ;;  %v2458_v30 = vld [vmem:[%s3218_s3 + $0xa] ss:$0 sm:$0xff] }
0x12be   : > { %v1763_v3 = vsel %vm1762_vm11, %v2503_v4, %v1759_v26 }
0x12bf   : > { %v1768_v46 = vsel %vm1765_vm13, %v1767_v42, %v1763_v3 }
0x12fc   : > { %v1800_v44 = vpop.permute.xlu2 %1799 }
0x12fd   : > { %v1807_v39 = vmul.f32 %v1800_v44, %v1768_v46 }
0x1306   : > { %v1725_v20 = vpop.f32.mrf.mxu3 }
0x1307   : > { %v1726_v33 = vadd.f32 %v2456_v2, %v1725_v20 }
0x1309   : > { %1801 = vrot.lane.b32.xlu0 %v1726_v33, %s2533_s13  ;;  %v1730_v47 = vsub.f32 0.0, %v1726_v33 }
0x130b   : > { %v1735_v40 = vmul.f32 1.442695, %v1730_v47 }
0x130c   : > { %v1798_v5 = vpop.permute.xlu1 %1797 }
0x130d   : > { %v1806_v9 = vmul.f32 %v1798_v5, %v1753_v45  ;;  %2504 = vpow2.f32 %v1735_v40 }
0x130f   : > { %1812 = vrot.lane.b32.xlu2 %v1806_v9, %s2532_s11 }
0x1311   : > { %1814 = vrot.lane.b32.xlu0 %v1807_v39, %s2532_s11 }
0x1313   : > { %v2505_v48 = vpop.eup %2504 }
0x1314   : > { %v1739_v6 = vadd.f32 1.0, %v2505_v48  ;;  %v1789_v49 = vpop.permute.xlu1 %1788 }
0x1315   : > { %v1791_v50 = vadd.f32 %v1789_v49, %v3064_v35  ;;  %v1792_v35 = vadd.f32 %v1789_v49, %v3067_v43  ;;  %v1793_v14 = vadd.f32 %v1789_v49, %v3072_v13 }
0x1316   : > { %2506 = vrcp.f32 %v1739_v6  ;;  %v1781_v58 = vand.u32 2147483648, %v1739_v6  ;;  %vm1775_vm5 = vweird.f32 %v1739_v6  ;;  %v1779_v60 = vand.u32 2147483647, %v1739_v6 }
0x1318   : > { %v1782_v62 = vor.u32 1.1754944e-38, %v1781_v58  ;;  %vm1780_vm1 = vcmp.eq.f32.partialorder %v1779_v60, 8.507059e+37 }
0x131c   : > { %v2507_v15 = vpop.eup %2506 }
0x131d   : > { %v1771_v51 = vmul.f32 %v2507_v15, %v1739_v6  ;;  %vm1776_vm14 = vweird.f32 %v2507_v15 }
0x131e   : > { %vm1777_vm0 = vmor %vm1775_vm5, %vm1776_vm14 }
0x131f   : > { %v1772_v55 = vsub.f32 1.0, %v1771_v51 }
0x1321   : > { %v1773_v56 = vmul.f32 %v2507_v15, %v1772_v55 }
0x1323   : > { %v1774_v57 = vadd.f32 %v2507_v15, %v1773_v56 }
0x1325   : > { %v1778_v61 = vsel %vm1777_vm0, %v2507_v15, %v1774_v57 }
0x1326   : > { %v1783_v2 = vsel %vm1780_vm1, %v1782_v62, %v1778_v61 }
0x1369   : > { %v1813_v52 = vpop.permute.xlu2 %1812 }
0x136a   : > { %v1821_v53 = vadd.f32 %v1813_v52, %v1791_v50 }
0x136c   : > { %1827 = vrot.lane.b32.xlu2 %v1821_v53, %s2533_s13 }
0x137b   : > { %v1802_v63 = vpop.permute.xlu0 %1801 }
0x137c   : > { %v1808_v7 = vmul.f32 %v1802_v63, %v1783_v2 }
0x137e   : > { %1816 = vrot.lane.b32.xlu1 %v1808_v7, %s2532_s11  ;;  %v1962_v7 = vld [vmem:[%s3222_s7 + $0x48] sm:$0xff] }
0x137f   : > { %1989 = vmatpush.msrb.mxu2 %v1962_v7 }
0x1383   : > { %v1815_v8 = vpop.permute.xlu0 %1814 }
0x1384   : > { %v1822_v10 = vadd.f32 %v1815_v8, %v1792_v35  ;;  %v1961_v35 = vld [vmem:[%s3222_s7 + $0x40] sm:$0xff] }
0x1385   : > { %1990 = vmatpush.msrb.mxu2 %v1961_v35 }
0x1386   : > { %1829 = vrot.lane.b32.xlu0 %v1822_v10, %s2533_s13 }
0x13c6   : > { %v1828_v11 = vpop.permute.xlu2 %1827 }
0x13c7   : > { %v1836_v12 = vsel %vm506_vm6, %v1828_v11, 0.0 }
0x13c8   : > { %1837 = vadd.xlane.f32.xlu2 %v1836_v12  ;;  %v1933_v12 = vld [vmem:[%s3221_s6 + $0x68] sm:$0xff] }
0x13c9   : > { %1955 = vmatpush.msrb.mxu1 %v1933_v12  ;;  %v2162_v12 = vld [vmem:[%s3221_s6 + $0x70] sm:$0xff] }
0x13f0   : > { %v1817_v16 = vpop.permute.xlu1 %1816 }
0x13f1   : > { %v1823_v17 = vadd.f32 %v1817_v16, %v1793_v14  ;;  %v1932_v14 = vld [vmem:[%s3221_s6 + $0x60] sm:$0xff] }
0x13f2   : > { %1956 = vmatpush.msrb.mxu1 %v1932_v14 }
0x13f3   : > { %1831 = vrot.lane.b32.xlu1 %v1823_v17, %s2533_s13 }
0x13f8   : > { %v1830_v18 = vpop.permute.xlu0 %1829 }
0x13f9   : > { %v1839_v19 = vsel %vm506_vm6, %v1830_v18, 0.0 }
0x13fa   : > { %1840 = vadd.xlane.f32.xlu0 %v1839_v19 }
0x143b   : > { %v1838_v54 = vpop.xlane.xlu2 %1837 }
0x143c   : > { %v1845_v43 = vmul.f32 %v1838_v54, %v2813_v59 }
0x143e   : > { %v1848_v21 = vsub.f32 %v1821_v53, %v1845_v43 }
0x1440   : > { %v1851_v22 = vmul.f32 %v1848_v21, %v1848_v21 }
0x1442   : > { %1857 = vrot.lane.b32.xlu2 %v1851_v22, %s2533_s13 }
0x1465   : > { %v1832_v23 = vpop.permute.xlu1 %1831 }
0x1466   : > { %v1842_v4 = vsel %vm506_vm6, %v1832_v23, 0.0 }
0x1467   : > { %1843 = vadd.xlane.f32.xlu1 %v1842_v4 }
0x146d   : > { %v1841_v13 = vpop.xlane.xlu0 %1840 }
0x146e   : > { %v1846_v24 = vmul.f32 %v1841_v13, %v2813_v59 }
0x1470   : > { %v1849_v25 = vsub.f32 %v1822_v10, %v1846_v24 }
0x1472   : > { %v1852_v27 = vmul.f32 %v1849_v25, %v1849_v25 }
0x1474   : > { %1859 = vrot.lane.b32.xlu0 %v1852_v27, %s2533_s13 }
0x149c   : > { %v1858_v28 = vpop.permute.xlu2 %1857 }
0x149d   : > { %v1866_v29 = vsel %vm506_vm6, %v1858_v28, 0.0 }
0x149e   : > { %1867 = vadd.xlane.f32.xlu0 %v1866_v29 }
0x14b2   : > { %1917 = vrot.lane.b32.xlu0 %v2458_v30, %s2532_s11 }
0x14da   : > { %v1844_v31 = vpop.xlane.xlu1 %1843 }
0x14db   : > { %v1847_v20 = vmul.f32 %v1844_v31, %v2813_v59 }
0x14dd   : > { %v3120_v32 = vsub.f32 %v1823_v17, %v1847_v20 }
0x14df   : > { %v1853_v26 = vmul.f32 %v3120_v32, %v3120_v32 }
0x14e1   : > { %1861 = vrot.lane.b32.xlu1 %v1853_v26, %s2533_s13 }
0x14e6   : > { %v1860_v33 = vpop.permute.xlu0 %1859 }
0x14e7   : > { %v1869_v34 = vsel %vm506_vm6, %v1860_v33, 0.0 }
0x14e8   : > { %1870 = vadd.xlane.f32.xlu2 %v1869_v34 }
0x1500   : > { %1926 = vrot.lane.b32.xlu2 %v2459_v0, %s2532_s11 }
0x1511   : > { %v1868_v37 = vpop.xlane.xlu0 %1867 }
0x1512   : > { %v1875_v38 = vmul.f32 %v1868_v37, %v2813_v59 }
0x1514   : > { %v1878_v41 = vadd.f32 1e-05, %v1875_v38 }
0x1516   : > { %2508 = vrsqrt.f32 %v1878_v41  ;;  %vm1887_vm3 = vweird.f32 %v1878_v41 }
0x151c   : > { %v2509_v3 = vpop.eup %2508 }
0x151d   : > { %v1882_v44 = vmul.f32 %v2509_v3, %v1878_v41  ;;  %vm1888_vm7 = vweird.f32 %v2509_v3 }
0x151e   : > { %vm1889_vm4 = vmor %vm1887_vm3, %vm1888_vm7 }
0x151f   : > { %v1883_v42 = vmul.f32 %v2509_v3, %v1882_v44 }
0x1521   : > { %v1884_v9 = vmul.f32 0.5, %v1883_v42 }
0x1523   : > { %v1885_v46 = vsub.f32 1.5, %v1884_v9 }
0x1524   : > { %v1918_v50 = vpop.permute.xlu0 %1917 }
0x1525   : > { %v1886_v48 = vmul.f32 %v2509_v3, %v1885_v46 }
0x1527   : > { %v1890_v6 = vsel %vm1889_vm4, %v2509_v3, %v1886_v48 }
0x1528   : > { %v1911_v49 = vmul.f32 %v1890_v6, %v1848_v21 }
0x152a   : > { %v1920_v55 = vmul.f32 %v1918_v50, %v1911_v49 }
0x1553   : > { %v1862_v5 = vpop.permute.xlu1 %1861 }
0x1554   : > { %v1872_v45 = vsel %vm506_vm6, %v1862_v5, 0.0 }
0x1555   : > { %1873 = vadd.xlane.f32.xlu1 %v1872_v45 }
0x155b   : > { %v1871_v39 = vpop.xlane.xlu2 %1870 }
0x155c   : > { %v1876_v47 = vmul.f32 %v1871_v39, %v2813_v59 }
0x155e   : > { %v1879_v40 = vadd.f32 1e-05, %v1876_v47 }
0x1560   : > { %2510 = vrsqrt.f32 %v1879_v40  ;;  %vm1897_vm9 = vweird.f32 %v1879_v40 }
0x1563   : > { %v1927_v53 = vpop.permute.xlu2 %1926 }
0x1564   : > { %v1929_v57 = vadd.f32 %v1927_v53, %v1920_v55 }
0x1566   : > { %v2511_v15 = vpop.eup %2510 }
0x1567   : > { %v1892_v51 = vmul.f32 %v2511_v15, %v1879_v40  ;;  %vm1898_vm8 = vweird.f32 %v2511_v15 }
0x1568   : > { %vm1899_vm10 = vmor %vm1897_vm9, %vm1898_vm8 }
0x1569   : > { %v1893_v52 = vmul.f32 %v2511_v15, %v1892_v51 }
0x156b   : > { %v1894_v56 = vmul.f32 0.5, %v1893_v52 }
0x156d   : > { %v1895_v58 = vsub.f32 1.5, %v1894_v56 }
0x156e   : > { %1967 = vrot.lane.b32.xlu1 %v1929_v57, %s2533_s13 }
0x156f   : > { %v1896_v60 = vmul.f32 %v2511_v15, %v1895_v58 }
0x1571   : > { %v1900_v61 = vsel %vm1899_vm10, %v2511_v15, %v1896_v60 }
0x1572   : > { %v1912_v62 = vmul.f32 %v1900_v61, %v1849_v25  ;;  %v2460_v25 = vld [vmem:[%s3219_s4 + $0x3] ss:$0 sm:$0xff] }
0x1574   : > { %v1921_v63 = vmul.f32 %v1918_v50, %v1912_v62 }
0x1576   : > { %v1930_v2 = vadd.f32 %v1927_v53, %v1921_v63 }
0x1578   : > { %1969 = vrot.lane.b32.xlu0 %v1930_v2, %s2533_s13 }
0x15c8   : > { %v1874_v8 = vpop.xlane.xlu1 %1873 }
0x15c9   : > { %v1877_v10 = vmul.f32 %v1874_v8, %v2813_v59 }
0x15cb   : > { %v1880_v11 = vadd.f32 1e-05, %v1877_v10  ;;  %v2163_v10 = vld [vmem:[%s3221_s6 + $0x78] sm:$0xff] }
0x15cd   : > { %2512 = vrsqrt.f32 %v1880_v11  ;;  %vm1907_vm12 = vweird.f32 %v1880_v11 }
0x15d3   : > { %v2513_v16 = vpop.eup %2512 }
0x15d4   : > { %v1902_v17 = vmul.f32 %v2513_v16, %v1880_v11  ;;  %vm1908_vm11 = vweird.f32 %v2513_v16 }
0x15d5   : > { %vm1909_vm13 = vmor %vm1907_vm12, %vm1908_vm11 }
0x15d6   : > { %v1903_v18 = vmul.f32 %v2513_v16, %v1902_v17 }
0x15d8   : > { %v1904_v19 = vmul.f32 0.5, %v1903_v18  ;;  %v2190_v18 = vld [vmem:[%s3223_s8 + $0x98] sm:$0xff] }
0x15da   : > { %v1905_v54 = vsub.f32 1.5, %v1904_v19  ;;  %v2189_v19 = vld [vmem:[%s3223_s8 + $0x90] sm:$0xff] }
0x15dc   : > { %v1906_v43 = vmul.f32 %v2513_v16, %v1905_v54  ;;  %v2462_v54 = vld [vmem:[%s3218_s3 + $0xd] ss:$0 sm:$0xff] }
0x15de   : > { %v1910_v59 = vsel %vm1909_vm13, %v2513_v16, %v1906_v43 }
0x15df   : > { %v1913_v21 = vmul.f32 %v1910_v59, %v3120_v32  ;;  %v2461_v32 = vld [vmem:[%s3218_s3 + $0xc] ss:$0 sm:$0xff] }
0x15e0   : > { %v1968_v22 = vpop.permute.xlu1 %1967 }
0x15e1   : > { %2378 = vmatmul.msk.f32.vlgmr.msrb.gmra.mxu2 %vm506_vm6, %v1968_v22  ;;  %v1922_v23 = vmul.f32 %v1918_v50, %v1913_v21  ;;  %v2463_v21 = vld [vmem:[%s3220_s5 + $0xb] ss:$0 sm:$0xff] }
0x15e3   : > { %v1931_v4 = vadd.f32 %v1927_v53, %v1922_v23 }
0x15e5   : > { %1937 = vrot.lane.b32.xlu2 %v1931_v4, %s2533_s13 }
0x15ea   : > { %v1970_v13 = vpop.permute.xlu0 %1969 }
0x15eb   : > { %2379 = vmatmul.msk.f32.gmra.mxu2 %vm506_vm6, %v1970_v13 }
0x163f   : > { %v1938_v24 = vpop.permute.xlu2 %1937 }
0x1640   : > { %2377 = vmatmul.msk.f32.vlgmr.msrb.gmra.mxu1 %vm506_vm6, %v1938_v24  ;;  %2380 = vmatmul.msk.f32.gmra.mxu2 %vm506_vm6, %v1938_v24 }
0x1664   : > { %v1992_v27 = vpop.f32.mrf.mxu2 }
0x1665   : > { %v1993_v28 = vadd.f32 %v2460_v25, %v1992_v27 }
0x1667   : > { %2079 = vrot.lane.b32.xlu2 %v1993_v28, %s2535_s17 }
0x166e   : > { %v1995_v29 = vpop.f32.mrf.mxu2 }
0x166f   : > { %v1996_v30 = vadd.f32 %v2460_v25, %v1995_v29 }
0x1671   : > { %2081 = vrot.lane.b32.xlu1 %v1996_v30, %s2535_s17 }
0x16bd   : > { %v1958_v26 = vpop.f32.mrf.mxu1 }
0x16be   : > { %v1959_v33 = vadd.f32 %v2461_v32, %v1958_v26 }
0x16c1   : > { %v2080_v37 = vpop.permute.xlu2 %2079 }
0x16c3   : > { %v1998_v31 = vpop.f32.mrf.mxu2 }
0x16c4   : > { %v1999_v20 = vadd.f32 %v2460_v25, %v1998_v31 }
0x16c6   : > { %2083 = vrot.lane.b32.xlu0 %v1999_v20, %s2535_s17  ;;  %2381 = vmatpush.xpose.msk.msra.mxu0 %vm454_vm2, %v1999_v20  ;;  %v2422_v42 = vpack.i.bf16 %v1996_v30, %v1999_v20 }
0x16ca   : > { %2382 = vmatpush.xpose.msk.msra.mxu0 %vm454_vm2, %v1996_v30 }
0x16ce   : > { %2077 = vrot.lane.b32.xlu0 %v1959_v33, %s2535_s17  ;;  %2383 = vmatpush.xpose.msk.msra.mxu0 %vm454_vm2, %v1993_v28 }
0x16d1   : > { %2384 = vmatmul.msk.f32.vlgmr.msra.gmra.mxu0 %vm454_vm2, %v1959_v33 }
0x16e3   : > { %v2082_v0 = vpop.permute.xlu1 %2081 }
0x1738   : > { %v2084_v34 = vpop.permute.xlu0 %2083 }
0x1739   : > { %2386 = vmatpush.xpose.msk.msra.mxu3 %vm454_vm2, %v2084_v34 }
0x173d   : > { %2387 = vmatpush.xpose.msk.msra.mxu3 %vm454_vm2, %v2082_v0 }
0x1740   : > { %v2078_v38 = vpop.permute.xlu0 %2077 }
0x1741   : > { %2388 = vmatpush.xpose.msk.msra.mxu3 %vm454_vm2, %v2080_v37 }
0x1744   : > { %2389 = vmatmul.msk.f32.vlgmr.msra.gmra.mxu3 %vm454_vm2, %v2078_v38 }
0x1745   : > { %2210 = vmatpush.msrb.mxu3 %v2190_v18 }
0x1747   : > { %2211 = vmatpush.msrb.mxu3 %v2189_v19 }
0x174e   : > { %v2030_v41 = vpop.f32.mrf.mxu0 }
0x174f   : > { %v2033_v3 = vmul.f32 0.35355338, %v2030_v41 }
0x1751   : > { %v2034_v44 = vsel %vm1076_vm15, %v2033_v3, -inf }
0x1752   : > { %2035 = vmax.xlane.f32.xlu2 %v2034_v44 }
0x176a   : > { %2423 = vrot.lane.b32.xlu2 %v2422_v42, %s2536_s20 }
0x1772   : > { %2045 = vrot.lane.b32.xlu2 %v1993_v28, %s2533_s13 }
0x17c5   : > { %v2036_v5 = vpop.xlane.xlu2 %2035 }
0x17c6   : > { %v2037_v15 = vsub.f32 %v2033_v3, %v2036_v5 }
0x17c7   : > { %v2110_v45 = vpop.f32.mrf.mxu3 }
0x17c8   : > { %v2113_v9 = vmul.f32 0.35355338, %v2110_v45  ;;  %v2038_v50 = vmul.f32 1.442695, %v2037_v15 }
0x17ca   : > { %v2114_v46 = vsel %vm1076_vm15, %v2113_v9, -inf }
0x17cb   : > { %2115 = vmax.xlane.f32.xlu1 %v2114_v46 }
0x17cd   : > { %v2424_v39 = vpop.permute.xlu2 %2423 }
0x17ce   : > { %v2425_v47 = vunpack.i.l.bf16 %v2424_v39  ;;  %v2426_v40 = vunpack.i.h.bf16 %v2424_v39 }
0x17d0   : > { %2150 = vmatpush.msrb.mxu0 %v2425_v47 }
0x17d2   : > { %2151 = vmatpush.msrb.mxu0 %v2426_v40 }
0x17d5   : > { %v2046_v35 = vpop.permute.xlu2 %2045 }
0x17e4   : > { %2125 = vrot.lane.b32.xlu1 %v1993_v28, %s2536_s20 }
0x183e   : > { %v2116_v48 = vpop.xlane.xlu1 %2115 }
0x183f   : > { %v2117_v6 = vsub.f32 %v2113_v9, %v2116_v48 }
0x1841   : > { %v2118_v49 = vmul.f32 1.442695, %v2117_v6 }
0x1843   : > { %2514 = vpow2.f32 %v2118_v49 }
0x1844   : > { %2516 = vpow2.f32 %v2038_v50 }
0x1849   : > { %v2515_v51 = vpop.eup %2514 }
0x184a   : > { %v2120_v52 = vsel %vm1076_vm15, %v2515_v51, 0.0  ;;  %v2517_v53 = vpop.eup %2516 }
0x184b   : > { %2121 = vadd.xlane.f32.xlu0 %v2120_v52  ;;  %v2040_v55 = vsel %vm1076_vm15, %v2517_v53, 0.0 }
0x1853   : > { %2041 = vadd.xlane.f32.xlu0 %v2040_v55 }
0x1856   : > { %v2126_v56 = vpop.permute.xlu1 %2125 }
0x1857   : > { %2152 = vmatpush.msrb.mxu0 %v2126_v56 }
0x1867   : > { %2428 = vrot.lane.b32.xlu0 %v2422_v42, %s2533_s13 }
0x18be   : > { %v2122_v57 = vpop.xlane.xlu0 %2121 }
0x18bf   : > { %2518 = vrcp.f32 %v2122_v57 }
0x18c5   : > { %v2519_v58 = vpop.eup %2518 }
0x18c6   : > { %v2124_v60 = vmul.f32 %v2519_v58, %v2515_v51  ;;  %v2042_v61 = vpop.xlane.xlu0 %2041 }
0x18c7   : > { %2520 = vrcp.f32 %v2042_v61 }
0x18c8   : > { %2390 = vmatmul.msk.f32.vlgmr.msrb.gmra.mxu0 %vm1076_vm15, %v2124_v60 }
0x18cd   : > { %v2521_v2 = vpop.eup %2520 }
0x18ce   : > { %v2044_v8 = vmul.f32 %v2521_v2, %v2517_v53 }
0x18d9   : > { %v2429_v62 = vpop.permute.xlu0 %2428 }
0x18da   : > { %v2430_v63 = vunpack.i.l.bf16 %v2429_v62  ;;  %v2431_v7 = vunpack.i.h.bf16 %v2429_v62 }
0x18dc   : > { %2070 = vmatpush.msra.mxu1 %v2430_v63 }
0x18de   : > { %2071 = vmatpush.msra.mxu1 %v2431_v7 }
0x18e0   : > { %2072 = vmatpush.msra.mxu1 %v2046_v35 }
0x18e1   : > { %2385 = vmatmul.msk.f32.vlgmr.msra.gmra.mxu1 %vm1076_vm15, %v2044_v8  ;;  %vm2216_vm15 = vcmp.lt.s32.totalorder %v2923_v1, 1 }
0x18e2   : > { %2183 = vmatpush.msrb.mxu1 %v2163_v10 }
0x18e4   : > { %2184 = vmatpush.msrb.mxu1 %v2162_v12 }
0x1945   : > { %v2154_v11 = vpop.f32.mrf.mxu0 }
0x1946   : > { %2158 = vrot.lane.b32.xlu1 %v2154_v11, %s2531_s23 }
0x195e   : > { %v2074_v14 = vpop.f32.mrf.mxu1 }
0x19b8   : > { %v2159_v16 = vpop.permute.xlu1 %2158 }
0x19b9   : > { %v2161_v17 = vsel %vm454_vm2, %v2074_v14, %v2159_v16  ;;  %vm2219_vm2 = vcmp.gt.s32.totalorder %v2923_v1, 1 }
0x19ba   : > { %2391 = vmatmul.msk.f32.vlgmr.msrb.gmra.mxu1 %vm506_vm6, %v2161_v17 }
0x1a37   : > { %v2186_v43 = vpop.f32.mrf.mxu1 }
0x1a38   : > { %v2187_v59 = vadd.f32 %v2462_v54, %v2186_v43 }
0x1a3a   : > { %2392 = vmatmul.msk.f32.vlgmr.msrb.gmra.mxu3 %vm506_vm6, %v2187_v59  ;;  %vm2223_vm6 = vcmask 23552  }
0x1abd   : > { %v2213_v22 = vpop.f32.mrf.mxu3 }
0x1abe   : > { %v2214_v23 = vadd.f32 %v2463_v21, %v2213_v22 }
0x1ac0   : > { %v2217_v4 = vand.u32 2147483647, %v2214_v23 }
0x1ac2   : > { %v2218_v13 = vsub.f32 0.0, %v2217_v4  ;;  %v2220_v24 = vsel %vm2219_vm2, %v2217_v4, %v2214_v23 }
0x1ac4   : > { %v2221_v25 = vsel %vm2216_vm15, %v2218_v13, %v2220_v24 }
0x1ac5   : > { %v2222_v27 = vadd.f32 %v2221_v25, %v2926_v36 }
0x1ac7   : > { %2224 = vst.msk [vmem:[%s363_s12] sm:$0xff] %vm2223_vm6, %v2222_v27 }
0x1ac8 PF: > { %s19_s30 = sadd.s32 1, %s2528_s30  }
0x1ac9   : > { %p16_p5 = scmp.ge.s32.totalorder %s19_s30, 4  }
0x1acb   :  { %18 = sbr.rel (!%p16_p5) target bundleno = 1 (0x1), region = 92 }

</bundles_post_ra>
